<compile_context>
chip_gen: v5e
topology: v5e:2x2
jax: 0.10.0
libtpu: 0.0.40
codegen_flags: <defaults>
</compile_context>

<pallas_src>
import jax
import jax.numpy as jnp
from jax.experimental import pallas as pl
from jax.experimental.pallas import tpu as pltpu

ENCODING_DIM = 3
IN_DIM = 28 * 28        # 784 (logical image dim, used as-is on the input side)
IN_DIM_PAD = 896        # 7 * 128, lane-dense OUTPUT width
HID_DIM = 256
BOT_DIM_PAD = 128       # bottleneck 3 -> 128 (zero padded)


def _cdiv(a, b):
    return -(-a // b)


def _round_up(x, m):
    return _cdiv(x, m) * m


def _autoencoder_kernel(x_ref,
                        w1_ref, b1_ref,
                        w2_ref, b2_ref,
                        w3_ref, b3_ref,
                        w4_ref, b4_ref,
                        o_ref):
    x = x_ref[...]                                            # (tb, 784) f32

    def dense(a, w_ref, b_ref):
        # cast activations to the weight dtype IN-KERNEL (bf16 on the default
        # path) so the MXU runs a single-pass bf16 matmul; accumulate in f32
        # and keep bias / elementwise math in f32.
        return jnp.dot(a.astype(w_ref.dtype), w_ref[...],
                       preferred_element_type=jnp.float32) + b_ref[...]

    h1 = jnp.maximum(dense(x, w1_ref, b1_ref), 0.0)           # (tb, 256)
    z = jnp.maximum(dense(h1, w2_ref, b2_ref), 0.0)           # (tb, 128), pad lanes 0
    h2 = jnp.maximum(dense(z, w3_ref, b3_ref), 0.0)           # (tb, 256)
    logits = dense(h2, w4_ref, b4_ref)                        # (tb, 896)

    # sigmoid: exp and the approximate reciprocal both ride the EUP slot
    sig = pl.reciprocal(1.0 + jnp.exp(-logits), approx=True)
    o_ref[...] = sig.astype(o_ref.dtype)


def _const_spec(shape):
    # grid-constant block (weights / biases): always block (0, 0)
    return pl.BlockSpec(shape, lambda i: (0, 0))


def autoencoder_forward(x, params, *, tb_max=512, out_dtype=None,
                        padded_output=False):
    """Fused autoencoder forward.

    x: (B, 784) float32, passed straight to the kernel (no wrapper pad/cast).
    params: from init_params (bf16 weights by default, f32 biases).
    tb_max: batch-tile upper bound (see header for per-generation guidance).
    out_dtype: output dtype; defaults to bf16 when the weights are bf16.
    padded_output: return the kernel-native (Bp, 896) lane-dense output and
      skip the wrapper slice copy (columns 784:896 hold sigmoid(0)=0.5).
    """
    B, D = x.shape
    assert D == IN_DIM

    w1, b1 = params["w1"], params["b1"]   # (784, 256) , (1, 256)
    w2, b2 = params["w2"], params["b2"]   # (256, 128) , (1, 128)
    w3, b3 = params["w3"], params["b3"]   # (128, 256) , (1, 256)
    w4, b4 = params["w4"], params["b4"]   # (256, 896) , (1, 896)
    wdtype = jnp.dtype(w1.dtype)

    if out_dtype is None:
        out_dtype = wdtype if wdtype == jnp.dtype(jnp.bfloat16) else jnp.float32
    out_dtype = jnp.dtype(out_dtype)

    # sublane granularity: 16 rows if any batch-tiled tensor is bf16, else 8
    sub = 16 if out_dtype == jnp.dtype(jnp.bfloat16) else 8

    # adaptive tile: never pad the batch by more than one sublane group
    n_steps = max(1, _cdiv(B, tb_max))
    tb = _round_up(_cdiv(B, n_steps), sub)
    Bp = _round_up(B, tb)

    xp = x if Bp == B else jnp.pad(x, ((0, Bp - B), (0, 0)))

    out = pl.pallas_call(
        _autoencoder_kernel,
        out_shape=jax.ShapeDtypeStruct((Bp, IN_DIM_PAD), out_dtype),
        grid_spec=pltpu.PrefetchScalarGridSpec(
            num_scalar_prefetch=0,
            grid=(Bp // tb,),
            in_specs=[
                # 784 == full feature extent -> valid despite not being 128-mult
                pl.BlockSpec((tb, IN_DIM), lambda i: (i, 0)),
                _const_spec(w1.shape), _const_spec(b1.shape),
                _const_spec(w2.shape), _const_spec(b2.shape),
                _const_spec(w3.shape), _const_spec(b3.shape),
                _const_spec(w4.shape), _const_spec(b4.shape),
            ],
            out_specs=pl.BlockSpec((tb, IN_DIM_PAD), lambda i: (i, 0)),
        ),
        compiler_params=pltpu.CompilerParams(
            dimension_semantics=("parallel",),          # megacore-shardable
            vmem_limit_bytes=32 * 1024 * 1024,
        ),
    )(xp, w1, b1, w2, b2, w3, b3, w4, b4)

    if padded_output:
        return out
    return out[:B, :IN_DIM]


def init_params(key, dtype=jnp.bfloat16):
    """nn.Linear-style init (U(-1/sqrt(fan_in), 1/sqrt(fan_in))).  Weights are
    stored pre-transposed as (in, out); the bottleneck (3) is zero-padded to
    128 and the decoder output (784) to 896 for lane-dense stores.  w1 keeps
    its logical (784, 256) shape so x needs no wrapper padding.  Biases stay
    f32; weights are bf16 by default (f32 also supported)."""
    def linear(k, fan_in, fan_out):
        kw, kb = jax.random.split(k)
        bound = 1.0 / jnp.sqrt(fan_in)
        w = jax.random.uniform(kw, (fan_in, fan_out), jnp.float32, -bound, bound)
        b = jax.random.uniform(kb, (1, fan_out), jnp.float32, -bound, bound)
        return w, b

    k1, k2, k3, k4 = jax.random.split(key, 4)
    w1, b1 = linear(k1, IN_DIM, HID_DIM)          # (784, 256)
    w2, b2 = linear(k2, HID_DIM, ENCODING_DIM)    # (256, 3)
    w3, b3 = linear(k3, ENCODING_DIM, HID_DIM)    # (3, 256)
    w4, b4 = linear(k4, HID_DIM, IN_DIM)          # (256, 784)

    # zero padding is numerically exact (ReLU(0)=0; padded rows/cols are 0)
    w2p = jnp.zeros((HID_DIM, BOT_DIM_PAD), jnp.float32).at[:, :ENCODING_DIM].set(w2)
    b2p = jnp.zeros((1, BOT_DIM_PAD), jnp.float32).at[:, :ENCODING_DIM].set(b2)
    w3p = jnp.zeros((BOT_DIM_PAD, HID_DIM), jnp.float32).at[:ENCODING_DIM, :].set(w3)
    w4p = jnp.zeros((HID_DIM, IN_DIM_PAD), jnp.float32).at[:, :IN_DIM].set(w4)
    b4p = jnp.zeros((1, IN_DIM_PAD), jnp.float32).at[:, :IN_DIM].set(b4)

    return dict(
        w1=w1.astype(dtype), b1=b1,
        w2=w2p.astype(dtype), b2=b2p,
        w3=w3p.astype(dtype), b3=b3,
        w4=w4p.astype(dtype), b4=b4p,
    )


def reference_forward(x, p):
    """Pure-JAX reference on the UNPADDED logical parameters (f32 math)."""
    w1 = p["w1"].astype(jnp.float32)
    w2 = p["w2"][:, :ENCODING_DIM].astype(jnp.float32)
    b2 = p["b2"][:, :ENCODING_DIM]
    w3 = p["w3"][:ENCODING_DIM, :].astype(jnp.float32)
    w4 = p["w4"][:, :IN_DIM].astype(jnp.float32)
    b4 = p["b4"][:, :IN_DIM]
    h1 = jnp.maximum(x @ w1 + p["b1"], 0.0)
    z = jnp.maximum(h1 @ w2 + b2, 0.0)
    h2 = jnp.maximum(z @ w3 + p["b3"], 0.0)
    return jax.nn.sigmoid(h2 @ w4 + b4)


if __name__ == "__main__":
    key = jax.random.PRNGKey(0)
    k_params, k_x = jax.random.split(key)

    B = 16
    x = jax.random.uniform(k_x, (B, IN_DIM), jnp.float32)   # "images" in [0,1)

    # --- default path: bf16 weights + bf16 output (mem-bound kernel) ---
    params = init_params(k_params)                           # bf16 by default
    out = jax.block_until_ready(autoencoder_forward(x, params))
    assert out.shape == (B, IN_DIM)
    assert out.dtype == jnp.bfloat16
    ref = reference_forward(x, params)
    err_bf16 = float(jnp.max(jnp.abs(out.astype(jnp.float32) - ref)))
    assert err_bf16 < 3e-2, f"bf16 mismatch vs reference: {err_bf16}"

    # --- padded-output path: no wrapper slice copy ---
    out_pad = jax.block_until_ready(
        autoencoder_forward(x, params, padded_output=True))
    assert out_pad.shape[1] == IN_DIM_PAD
    err_pad = float(jnp.max(jnp.abs(
        out_pad[:B, :IN_DIM].astype(jnp.float32) - ref)))
    assert err_pad < 3e-2, f"padded-output mismatch vs reference: {err_pad}"

    # --- f32 weights path (tight check; approx reciprocal adds ~1e-3) ---
    params_f32 = init_params(k_params, dtype=jnp.float32)
    out_f32 = jax.block_until_ready(autoencoder_forward(x, params_f32))
    assert out_f32.dtype == jnp.float32
    ref_f32 = reference_forward(x, params_f32)
    err_f32 = float(jnp.max(jnp.abs(out_f32 - ref_f32)))
    assert err_f32 < 3e-3, f"f32 mismatch vs reference: {err_f32}"

    print("KERNEL_OK")
</pallas_src>

<mosaic_0001>
module attributes {stable_mosaic.version = 11 : i64} {
  func.func @_autoencoder_kernel(%arg0: i32, %arg1: memref<16x784xf32, #tpu.memory_space<vmem>>, %arg2: memref<784x256xbf16, #tpu.memory_space<vmem>>, %arg3: memref<1x256xf32, #tpu.memory_space<vmem>>, %arg4: memref<256x128xbf16, #tpu.memory_space<vmem>>, %arg5: memref<1x128xf32, #tpu.memory_space<vmem>>, %arg6: memref<128x256xbf16, #tpu.memory_space<vmem>>, %arg7: memref<1x256xf32, #tpu.memory_space<vmem>>, %arg8: memref<256x896xbf16, #tpu.memory_space<vmem>>, %arg9: memref<1x896xf32, #tpu.memory_space<vmem>>, %arg10: memref<16x896xbf16, #tpu.memory_space<vmem>>) attributes {dimension_semantics = [#tpu.dimension_semantics<parallel>], iteration_bounds = array<i64: 1>, scalar_prefetch = 0 : i64, scratch_operands = 0 : i64, tpu.core_type = #tpu.core_type<tc>, window_params = [{transform_indices = @transform_0, window_bounds = array<i64: 16, 784>}, {pipeline_mode = #tpu.pipeline_mode<synchronous>, transform_indices = @transform_1, window_bounds = array<i64: 784, 256>}, {pipeline_mode = #tpu.pipeline_mode<synchronous>, transform_indices = @transform_2, window_bounds = array<i64: 1, 256>}, {pipeline_mode = #tpu.pipeline_mode<synchronous>, transform_indices = @transform_3, window_bounds = array<i64: 256, 128>}, {pipeline_mode = #tpu.pipeline_mode<synchronous>, transform_indices = @transform_4, window_bounds = array<i64: 1, 128>}, {pipeline_mode = #tpu.pipeline_mode<synchronous>, transform_indices = @transform_5, window_bounds = array<i64: 128, 256>}, {pipeline_mode = #tpu.pipeline_mode<synchronous>, transform_indices = @transform_6, window_bounds = array<i64: 1, 256>}, {pipeline_mode = #tpu.pipeline_mode<synchronous>, transform_indices = @transform_7, window_bounds = array<i64: 256, 896>}, {pipeline_mode = #tpu.pipeline_mode<synchronous>, transform_indices = @transform_8, window_bounds = array<i64: 1, 896>}, {transform_indices = @transform_9, window_bounds = array<i64: 16, 896>}]} {
    %c0 = arith.constant 0 : index
    %c0_0 = arith.constant 0 : index
    %0 = vector.load %arg1[%c0, %c0_0] : memref<16x784xf32, #tpu.memory_space<vmem>>, vector<16x784xf32>
    %1 = arith.truncf %0 : vector<16x784xf32> to vector<16x784xbf16>
    %c0_1 = arith.constant 0 : index
    %c0_2 = arith.constant 0 : index
    %2 = vector.load %arg2[%c0_1, %c0_2] : memref<784x256xbf16, #tpu.memory_space<vmem>>, vector<784x256xbf16>
    %cst = arith.constant dense<0.000000e+00> : vector<16x256xf32>
    %3 = tpu.matmul %1, %2, %cst {dimension_numbers = #tpu.dot_dimension_numbers<[1], [0], [0], [1], [0, 0, 1, 1], [], []>} : vector<16x784xbf16>, vector<784x256xbf16>, vector<16x256xf32> -> vector<16x256xf32>
    %c0_3 = arith.constant 0 : index
    %c0_4 = arith.constant 0 : index
    %4 = vector.load %arg3[%c0_3, %c0_4] : memref<1x256xf32, #tpu.memory_space<vmem>>, vector<1x256xf32>
    %5 = vector.broadcast %4 : vector<1x256xf32> to vector<16x256xf32>
    %6 = arith.addf %3, %5 : vector<16x256xf32>
    %cst_5 = arith.constant 0.000000e+00 : f32
    %7 = vector.broadcast %cst_5 : f32 to vector<16x256xf32>
    %8 = arith.maximumf %6, %7 : vector<16x256xf32>
    %9 = arith.truncf %8 : vector<16x256xf32> to vector<16x256xbf16>
    %c0_6 = arith.constant 0 : index
    %c0_7 = arith.constant 0 : index
    %10 = vector.load %arg4[%c0_6, %c0_7] : memref<256x128xbf16, #tpu.memory_space<vmem>>, vector<256x128xbf16>
    %cst_8 = arith.constant dense<0.000000e+00> : vector<16x128xf32>
    %11 = tpu.matmul %9, %10, %cst_8 {dimension_numbers = #tpu.dot_dimension_numbers<[1], [0], [0], [1], [0, 0, 1, 1], [], []>} : vector<16x256xbf16>, vector<256x128xbf16>, vector<16x128xf32> -> vector<16x128xf32>
    %c0_9 = arith.constant 0 : index
    %c0_10 = arith.constant 0 : index
    %12 = vector.load %arg5[%c0_9, %c0_10] : memref<1x128xf32, #tpu.memory_space<vmem>>, vector<1x128xf32>
    %13 = vector.broadcast %12 : vector<1x128xf32> to vector<16x128xf32>
    %14 = arith.addf %11, %13 : vector<16x128xf32>
    %cst_11 = arith.constant 0.000000e+00 : f32
    %15 = vector.broadcast %cst_11 : f32 to vector<16x128xf32>
    %16 = arith.maximumf %14, %15 : vector<16x128xf32>
    %17 = arith.truncf %16 : vector<16x128xf32> to vector<16x128xbf16>
    %c0_12 = arith.constant 0 : index
    %c0_13 = arith.constant 0 : index
    %18 = vector.load %arg6[%c0_12, %c0_13] : memref<128x256xbf16, #tpu.memory_space<vmem>>, vector<128x256xbf16>
    %cst_14 = arith.constant dense<0.000000e+00> : vector<16x256xf32>
    %19 = tpu.matmul %17, %18, %cst_14 {dimension_numbers = #tpu.dot_dimension_numbers<[1], [0], [0], [1], [0, 0, 1, 1], [], []>} : vector<16x128xbf16>, vector<128x256xbf16>, vector<16x256xf32> -> vector<16x256xf32>
    %c0_15 = arith.constant 0 : index
    %c0_16 = arith.constant 0 : index
    %20 = vector.load %arg7[%c0_15, %c0_16] : memref<1x256xf32, #tpu.memory_space<vmem>>, vector<1x256xf32>
    %21 = vector.broadcast %20 : vector<1x256xf32> to vector<16x256xf32>
    %22 = arith.addf %19, %21 : vector<16x256xf32>
    %cst_17 = arith.constant 0.000000e+00 : f32
    %23 = vector.broadcast %cst_17 : f32 to vector<16x256xf32>
    %24 = arith.maximumf %22, %23 : vector<16x256xf32>
    %25 = arith.truncf %24 : vector<16x256xf32> to vector<16x256xbf16>
    %c0_18 = arith.constant 0 : index
    %c0_19 = arith.constant 0 : index
    %26 = vector.load %arg8[%c0_18, %c0_19] : memref<256x896xbf16, #tpu.memory_space<vmem>>, vector<256x896xbf16>
    %cst_20 = arith.constant dense<0.000000e+00> : vector<16x896xf32>
    %27 = tpu.matmul %25, %26, %cst_20 {dimension_numbers = #tpu.dot_dimension_numbers<[1], [0], [0], [1], [0, 0, 1, 1], [], []>} : vector<16x256xbf16>, vector<256x896xbf16>, vector<16x896xf32> -> vector<16x896xf32>
    %c0_21 = arith.constant 0 : index
    %c0_22 = arith.constant 0 : index
    %28 = vector.load %arg9[%c0_21, %c0_22] : memref<1x896xf32, #tpu.memory_space<vmem>>, vector<1x896xf32>
    %29 = vector.broadcast %28 : vector<1x896xf32> to vector<16x896xf32>
    %30 = arith.addf %27, %29 : vector<16x896xf32>
    %cst_23 = arith.constant 0.000000e+00 : f32
    %31 = vector.broadcast %cst_23 : f32 to vector<16x896xf32>
    %32 = arith.subf %31, %30 : vector<16x896xf32>
    %33 = math.exp %32 : vector<16x896xf32>
    %cst_24 = arith.constant 1.000000e+00 : f32
    %34 = vector.broadcast %cst_24 : f32 to vector<16x896xf32>
    %35 = arith.addf %34, %33 : vector<16x896xf32>
    %36 = tpu.reciprocal %35 {approx = true} : vector<16x896xf32> -> vector<16x896xf32>
    %37 = arith.truncf %36 : vector<16x896xf32> to vector<16x896xbf16>
    %c0_25 = arith.constant 0 : index
    %c0_26 = arith.constant 0 : index
    %38 = vector.load %arg10[%c0_25, %c0_26] : memref<16x896xbf16, #tpu.memory_space<vmem>>, vector<16x896xbf16>
    tpu.vector_store %arg10[%c0_25, %c0_26], %37 {strides = array<i32>} : memref<16x896xbf16, #tpu.memory_space<vmem>>, vector<16x896xbf16>,
    return
  }
  func.func @transform_0(%arg0: i32) -> (i32, i32) {
    %c0_i32 = arith.constant 0 : i32
    %c0_i32_0 = arith.constant 0 : i32
    return %arg0, %c0_i32 : i32, i32
  }
  func.func @transform_1(%arg0: i32) -> (i32, i32) {
    %c0_i32 = arith.constant 0 : i32
    %c0_i32_0 = arith.constant 0 : i32
    %c0_i32_1 = arith.constant 0 : i32
    return %c0_i32, %c0_i32_0 : i32, i32
  }
  func.func @transform_2(%arg0: i32) -> (i32, i32) {
    %c0_i32 = arith.constant 0 : i32
    %c0_i32_0 = arith.constant 0 : i32
    %c0_i32_1 = arith.constant 0 : i32
    return %c0_i32, %c0_i32_0 : i32, i32
  }
  func.func @transform_3(%arg0: i32) -> (i32, i32) {
    %c0_i32 = arith.constant 0 : i32
    %c0_i32_0 = arith.constant 0 : i32
    %c0_i32_1 = arith.constant 0 : i32
    return %c0_i32, %c0_i32_0 : i32, i32
  }
  func.func @transform_4(%arg0: i32) -> (i32, i32) {
    %c0_i32 = arith.constant 0 : i32
    %c0_i32_0 = arith.constant 0 : i32
    %c0_i32_1 = arith.constant 0 : i32
    return %c0_i32, %c0_i32_0 : i32, i32
  }
  func.func @transform_5(%arg0: i32) -> (i32, i32) {
    %c0_i32 = arith.constant 0 : i32
    %c0_i32_0 = arith.constant 0 : i32
    %c0_i32_1 = arith.constant 0 : i32
    return %c0_i32, %c0_i32_0 : i32, i32
  }
  func.func @transform_6(%arg0: i32) -> (i32, i32) {
    %c0_i32 = arith.constant 0 : i32
    %c0_i32_0 = arith.constant 0 : i32
    %c0_i32_1 = arith.constant 0 : i32
    return %c0_i32, %c0_i32_0 : i32, i32
  }
  func.func @transform_7(%arg0: i32) -> (i32, i32) {
    %c0_i32 = arith.constant 0 : i32
    %c0_i32_0 = arith.constant 0 : i32
    %c0_i32_1 = arith.constant 0 : i32
    return %c0_i32, %c0_i32_0 : i32, i32
  }
  func.func @transform_8(%arg0: i32) -> (i32, i32) {
    %c0_i32 = arith.constant 0 : i32
    %c0_i32_0 = arith.constant 0 : i32
    %c0_i32_1 = arith.constant 0 : i32
    return %c0_i32, %c0_i32_0 : i32, i32
  }
  func.func @transform_9(%arg0: i32) -> (i32, i32) {
    %c0_i32 = arith.constant 0 : i32
    %c0_i32_0 = arith.constant 0 : i32
    return %arg0, %c0_i32 : i32, i32
  }
}

</mosaic_0001>

<bundles_post_ra>
// kernel: tpu_custom_call.1
= control target key start
LH: loop header
LB: loop body
LE: loop exit
PB: predicated region body
PF: predicated region fallthrough
CT: control target
= control target key end

     0   :  { %14 = vsyncpa [#allocation3], 0  ;;  %s3972_s0 = inlined_call_operand.hbm [shape: f32[16,784], index: 0, kind: input, shape index: {}]   ;;  %s3973_s1 = inlined_call_operand.hbm [shape: bf16[784,256], index: 1, kind: input, shape index: {}]   ;;  %s3974_s2 = inlined_call_operand.hbm [shape: f32[1,256], index: 2, kind: input, shape index: {}]   ;;  %s3975_s3 = inlined_call_operand.hbm [shape: bf16[256,128], index: 3, kind: input, shape index: {}]   ;;  %s3976_s4 = inlined_call_operand.hbm [shape: f32[1,128], index: 4, kind: input, shape index: {}]   ;;  %s3977_s5 = inlined_call_operand.hbm [shape: bf16[128,256], index: 5, kind: input, shape index: {}]   ;;  %s3978_s6 = inlined_call_operand.hbm [shape: f32[1,256], index: 6, kind: input, shape index: {}]   ;;  %s3979_s7 = inlined_call_operand.hbm [shape: bf16[256,896], index: 7, kind: input, shape index: {}]   ;;  %s3980_s8 = inlined_call_operand.vmem [shape: f32[1,896], index: 8, kind: input, shape index: {}]   ;;  %s3981_s9 = inlined_call_operand.hbm [shape: bf16[16,896], index: 9, kind: output, shape index: {}]  }
   0x1   :  { %15 = vsyncpa [#allocation6], 0 }
   0x2   :  { %16 = vsyncpa [#allocation9], 0 }
   0x3   :  { %17 = vsyncpa [#allocation12], 0 }
   0x4   :  { %18 = vsyncpa [#allocation15], 0  ;;  %s37_s11 = sshll.u32 %s3973_s1, 4  ;;  %s38_s11 = int_to_ptr.hbm [resolvable:$true] %s37_s11 }
   0x5   :  { %19 = vsyncpa [#allocation4], 0  ;;  %s3812_s12 = smov [#allocation5]   ;;  %s61_s16 = sshll.u32 %s3975_s3, 4  ;;  %s62_s16 = int_to_ptr.hbm [resolvable:$true] %s61_s16 }
   0x6   :  { %s39_s13 = sshll.u32 %s3812_s12, 4  ;;  %s3813_s17 = smov 128   ;;  %s40_s13 = int_to_ptr.vmem [resolvable:$true] %s39_s13 }
   0x7   :  { %s3814_s18 = smov 8   ;;  %s3815_s19 = smov [#allocation8]  }
   0x8   :  { %45 = dma.hbm_to_vmem [thread:$0]  %s38_s11, 12544, %s40_s13, [#allocation6], %s3813_s17, %s3813_s17, %s3814_s18  }
   0x9   :  { %s63_s20 = sshll.u32 %s3815_s19, 4  ;;  %s3816_s21 = smov 64   ;;  %s64_s20 = int_to_ptr.vmem [resolvable:$true] %s63_s20 }
   0xa   :  { %s3817_s22 = smov 4   ;;  %s85_s24 = sshll.u32 %s3977_s5, 4  ;;  %s86_s24 = int_to_ptr.hbm [resolvable:$true] %s85_s24 }
   0xb   :  { %69 = dma.hbm_to_vmem [thread:$0]  %s62_s16, 2048, %s64_s20, [#allocation9], %s3816_s21, %s3816_s21, %s3817_s22  }
   0xc   :  { %s3818_s25 = smov [#allocation11]   ;;  %s24_s28 = sshll.u32 %s3972_s0, 4  ;;  %s25_s28 = int_to_ptr.hbm [resolvable:$true] %s24_s28 }
   0xd   :  { %s87_s26 = sshll.u32 %s3818_s25, 4  ;;  %s3819_s29 = smov [#allocation2]   ;;  %s88_s26 = int_to_ptr.vmem [resolvable:$true] %s87_s26 }
   0xe   :  { %93 = dma.hbm_to_vmem [thread:$0]  %s86_s24, 2048, %s88_s26, [#allocation12], %s3813_s17, %s3813_s17, %s3814_s18  }
   0xf   :  { %s26_s30 = sshll.u32 %s3819_s29, 4  ;;  %s3820_s10 = smov 896   ;;  %s27_s30 = int_to_ptr.vmem [resolvable:$true] %s26_s30 }
  0x10   :  { %s3821_s11 = smov 56   ;;  %s51_s5 = sshll.u32 %s3974_s2, 4  ;;  %s52_s5 = int_to_ptr.hbm [resolvable:$true] %s51_s5 }
  0x11   :  { %32 = dma.hbm_to_vmem [thread:$0]  %s25_s28, 1792, %s27_s30, [#allocation3], %s3820_s10, %s3820_s10, %s3821_s11  }
  0x12   :  { %s3822_s14 = smov [#allocation7]   ;;  %s75_s0 = sshll.u32 %s3976_s4, 4  ;;  %s76_s0 = int_to_ptr.hbm [resolvable:$true] %s75_s0 }
  0x13   :  { %s53_s15 = sshll.u32 %s3822_s14, 4  ;;  %s3823_s17 = smov [#allocation10]   ;;  %s54_s15 = int_to_ptr.vmem [resolvable:$true] %s53_s15 }
  0x14   :  { %56 = dma.hbm_to_vmem [thread:$0]  %s52_s5, 32, %s54_s15, [#allocation6]  }
  0x15   :  { %s77_s18 = sshll.u32 %s3823_s17, 4  ;;  %s99_s22 = sshll.u32 %s3978_s6, 4  ;;  %s78_s18 = int_to_ptr.vmem [resolvable:$true] %s77_s18  ;;  %s100_s22 = int_to_ptr.hbm [resolvable:$true] %s99_s22 }
  0x16   :  { %80 = dma.hbm_to_vmem [thread:$0]  %s76_s0, 16, %s78_s18, [#allocation9]  }
  0x17   :  { %s109_s23 = sshll.u32 %s3979_s7, 4  ;;  %s3824_s24 = smov [#allocation13]   ;;  %s110_s23 = int_to_ptr.hbm [resolvable:$true] %s109_s23 }
  0x18   :  { %s101_s25 = sshll.u32 %s3824_s24, 4  ;;  %s3825_s4 = smov [#allocation14]   ;;  %s102_s25 = int_to_ptr.vmem [resolvable:$true] %s101_s25 }
  0x19   :  { %104 = dma.hbm_to_vmem [thread:$0]  %s100_s22, 32, %s102_s25, [#allocation12]  }
  0x1a   :  { %s111_s26 = sshll.u32 %s3825_s4, 4  ;;  %s3826_s27 = smov 448   ;;  %s112_s26 = int_to_ptr.vmem [resolvable:$true] %s111_s26 }
  0x1b   :  { %s3827_s3 = smov 28  }
  0x1c   :  { %117 = dma.hbm_to_vmem [thread:$0]  %s110_s23, 14336, %s112_s26, [#allocation15], %s3826_s27, %s3826_s27, %s3827_s3  }
  0x1d   :  { %3800 = dma.done.wait [#allocation3], 1792  }
  0x1e   :  { %3801 = vsyncadd [#allocation3], 4294965504 }
  0x1f   :  { %3802 = dma.done.wait [#allocation6], 12576  }
  0x20   :  { %3803 = vsyncadd [#allocation6], 4294954720 }
  0x21   :  { %3804 = dma.done.wait [#allocation9], 2064  }
  0x22   :  { %3805 = vsyncadd [#allocation9], 4294965232 }
  0x23   :  { %3806 = dma.done.wait [#allocation12], 2080  }
  0x24   :  { %3807 = vsyncadd [#allocation12], 4294965216 }
  0x25   :  { %3808 = dma.done.wait [#allocation15], 14336  }
  0x26   :  { %3809 = vsyncadd [#allocation15], 4294952960  ;;  %v2356_v0 = vld [vmem:[#allocation5 + $0x70] sm:$0xf]  ;;  %v3283_v1 = vld [vmem:[#allocation5 + $0x74] sm:$0xf0] }
  0x27   :  { %v2484_v2 = vld [vmem:[#allocation5 + $0x170] sm:$0xf]  ;;  %v2357_v3 = vor.u32 %v3283_v1, %v2356_v0  ;;  %v3315_v4 = vld [vmem:[#allocation5 + $0x174] sm:$0xf0]  ;;  %v2348_v11 = vld [vmem:[#allocation5 + $0x60] sm:$0xf] }
  0x28   :  { %v2548_v5 = vld [vmem:[#allocation5 + $0x1f0] sm:$0xf]  ;;  %v3331_v6 = vld [vmem:[#allocation5 + $0x1f4] sm:$0xf0]  ;;  %v2485_v7 = vor.u32 %v3315_v4, %v2484_v2  ;;  %v3281_v13 = vld [vmem:[#allocation5 + $0x64] sm:$0xf0] }
  0x29   :  { %v2549_v8 = vor.u32 %v3331_v6, %v2548_v5  ;;  %v2420_v9 = vld [vmem:[#allocation5 + $0xf0] sm:$0xf]  ;;  %v3299_v10 = vld [vmem:[#allocation5 + $0xf4] sm:$0xf0]  ;;  %772 = vmatpush.bf16.msra.mxu0 %v2357_v3  ;;  %v2476_v14 = vld [vmem:[#allocation5 + $0x160] sm:$0xf]  ;;  %v2349_v16 = vor.u32 %v3281_v13, %v2348_v11 }
  0x2a   :  { %v2421_v12 = vor.u32 %v3299_v10, %v2420_v9  ;;  %v3313_v15 = vld [vmem:[#allocation5 + $0x164] sm:$0xf0]  ;;  %800 = vmatpush.bf16.msra.mxu2 %v2485_v7  ;;  %v2540_v18 = vld [vmem:[#allocation5 + $0x1e0] sm:$0xf]  ;;  %v2340_v23 = vld [vmem:[#allocation5 + $0x50] sm:$0xf] }
  0x2b   :  { %814 = vmatpush.bf16.msra.mxu3 %v2549_v8  ;;  %v2477_v17 = vor.u32 %v3313_v15, %v2476_v14  ;;  %v3329_v19 = vld [vmem:[#allocation5 + $0x1e4] sm:$0xf0]  ;;  %v2412_v20 = vld [vmem:[#allocation5 + $0xe0] sm:$0xf]  ;;  %v3279_v24 = vld [vmem:[#allocation5 + $0x54] sm:$0xf0] }
  0x2c   :  { %786 = vmatpush.bf16.msra.mxu1 %v2421_v12  ;;  %v2541_v21 = vor.u32 %v3329_v19, %v2540_v18  ;;  %v3297_v22 = vld [vmem:[#allocation5 + $0xe4] sm:$0xf0]  ;;  %v2468_v26 = vld [vmem:[#allocation5 + $0x150] sm:$0xf]  ;;  %v3311_v27 = vld [vmem:[#allocation5 + $0x154] sm:$0xf0]  ;;  %v2341_v29 = vor.u32 %v3279_v24, %v2340_v23 }
  0x2d   :  { %v2413_v25 = vor.u32 %v3297_v22, %v2412_v20  ;;  %v2532_v28 = vld [vmem:[#allocation5 + $0x1d0] sm:$0xf]  ;;  %773 = vmatpush.bf16.msra.mxu0 %v2349_v16  ;;  %v3327_v30 = vld [vmem:[#allocation5 + $0x1d4] sm:$0xf0]  ;;  %v2469_v33 = vor.u32 %v3311_v27, %v2468_v26  ;;  %v2332_v35 = vld [vmem:[#allocation5 + $0x40] sm:$0xf] }
  0x2e   :  { %v2404_v31 = vld [vmem:[#allocation5 + $0xd0] sm:$0xf]  ;;  %v3295_v32 = vld [vmem:[#allocation5 + $0xd4] sm:$0xf0]  ;;  %801 = vmatpush.bf16.msra.mxu2 %v2477_v17  ;;  %v2533_v34 = vor.u32 %v3327_v30, %v2532_v28  ;;  %v3277_v36 = vld [vmem:[#allocation5 + $0x44] sm:$0xf0] }
  0x2f   :  { %815 = vmatpush.bf16.msra.mxu3 %v2541_v21  ;;  %v2460_v37 = vld [vmem:[#allocation5 + $0x140] sm:$0xf]  ;;  %v2405_v38 = vor.u32 %v3295_v32, %v2404_v31  ;;  %v3309_v39 = vld [vmem:[#allocation5 + $0x144] sm:$0xf0]  ;;  %v2333_v44 = vor.u32 %v3277_v36, %v2332_v35  ;;  %v2324_v47 = vld [vmem:[#allocation5 + $0x30] sm:$0xf] }
  0x30   :  { %787 = vmatpush.bf16.msra.mxu1 %v2413_v25  ;;  %v2524_v40 = vld [vmem:[#allocation5 + $0x1c0] sm:$0xf]  ;;  %v3325_v41 = vld [vmem:[#allocation5 + $0x1c4] sm:$0xf0]  ;;  %v2461_v45 = vor.u32 %v3309_v39, %v2460_v37  ;;  %v3275_v48 = vld [vmem:[#allocation5 + $0x34] sm:$0xf0] }
  0x31   :  { %v2396_v42 = vld [vmem:[#allocation5 + $0xc0] sm:$0xf]  ;;  %v3293_v43 = vld [vmem:[#allocation5 + $0xc4] sm:$0xf0]  ;;  %774 = vmatpush.bf16.msra.mxu0 %v2341_v29  ;;  %v2525_v46 = vor.u32 %v3325_v41, %v2524_v40  ;;  %v2452_v49 = vld [vmem:[#allocation5 + $0x130] sm:$0xf]  ;;  %v2325_v56 = vor.u32 %v3275_v48, %v2324_v47 }
  0x32   :  { %802 = vmatpush.bf16.msra.mxu2 %v2469_v33  ;;  %v2397_v50 = vor.u32 %v3293_v43, %v2396_v42  ;;  %v3307_v51 = vld [vmem:[#allocation5 + $0x134] sm:$0xf0]  ;;  %v2516_v52 = vld [vmem:[#allocation5 + $0x1b0] sm:$0xf]  ;;  %v2316_v59 = vld [vmem:[#allocation5 + $0x20] sm:$0xf] }
  0x33   :  { %816 = vmatpush.bf16.msra.mxu3 %v2533_v34  ;;  %v3323_v53 = vld [vmem:[#allocation5 + $0x1b4] sm:$0xf0]  ;;  %v2388_v54 = vld [vmem:[#allocation5 + $0xb0] sm:$0xf]  ;;  %v2453_v57 = vor.u32 %v3307_v51, %v2452_v49  ;;  %v3273_v60 = vld [vmem:[#allocation5 + $0x24] sm:$0xf0] }
  0x34   :  { %788 = vmatpush.bf16.msra.mxu1 %v2405_v38  ;;  %v3291_v55 = vld [vmem:[#allocation5 + $0xb4] sm:$0xf0]  ;;  %v2517_v58 = vor.u32 %v3323_v53, %v2516_v52  ;;  %v2444_v61 = vld [vmem:[#allocation5 + $0x120] sm:$0xf]  ;;  %v3305_v63 = vld [vmem:[#allocation5 + $0x124] sm:$0xf0]  ;;  %v2317_v4 = vor.u32 %v3273_v60, %v2316_v59 }
  0x35   :  { %775 = vmatpush.bf16.msra.mxu0 %v2333_v44  ;;  %v2389_v62 = vor.u32 %v3291_v55, %v2388_v54  ;;  %v2508_v0 = vld [vmem:[#allocation5 + $0x1a0] sm:$0xf]  ;;  %v3321_v1 = vld [vmem:[#allocation5 + $0x1a4] sm:$0xf0]  ;;  %v2308_v5 = vld [vmem:[#allocation5 + $0x10] sm:$0xf]  ;;  %v2445_v6 = vor.u32 %v3305_v63, %v2444_v61 }
  0x36   :  { %803 = vmatpush.bf16.msra.mxu2 %v2461_v45  ;;  %v2380_v2 = vld [vmem:[#allocation5 + $0xa0] sm:$0xf]  ;;  %v3289_v3 = vld [vmem:[#allocation5 + $0xa4] sm:$0xf0]  ;;  %v2509_v7 = vor.u32 %v3321_v1, %v2508_v0  ;;  %v3271_v8 = vld [vmem:[#allocation5 + $0x14] sm:$0xf0] }
  0x37   :  { %817 = vmatpush.bf16.msra.mxu3 %v2525_v46  ;;  %v2436_v9 = vld [vmem:[#allocation5 + $0x110] sm:$0xf]  ;;  %v3303_v10 = vld [vmem:[#allocation5 + $0x114] sm:$0xf0]  ;;  %v2381_v11 = vor.u32 %v3289_v3, %v2380_v2  ;;  %v2300_v16 = vld [vmem:[#allocation5] sm:$0xf]  ;;  %v2309_v18 = vor.u32 %v3271_v8, %v2308_v5 }
  0x38   :  { %789 = vmatpush.bf16.msra.mxu1 %v2397_v50  ;;  %v2500_v12 = vld [vmem:[#allocation5 + $0x190] sm:$0xf]  ;;  %v3319_v13 = vld [vmem:[#allocation5 + $0x194] sm:$0xf0]  ;;  %v3269_v17 = vld [vmem:[#allocation5 + $0x4] sm:$0xf0]  ;;  %v2437_v23 = vor.u32 %v3303_v10, %v2436_v9 }
  0x39   :  { %776 = vmatpush.bf16.msra.mxu0 %v2325_v56  ;;  %v2372_v14 = vld [vmem:[#allocation5 + $0x90] sm:$0xf]  ;;  %v3287_v15 = vld [vmem:[#allocation5 + $0x94] sm:$0xf0]  ;;  %v2428_v19 = vld [vmem:[#allocation5 + $0x100] sm:$0xf]  ;;  %v2501_v24 = vor.u32 %v3319_v13, %v2500_v12  ;;  %v2301_v35 = vor.u32 %v3269_v17, %v2300_v16 }
  0x3a   :  { %804 = vmatpush.bf16.msra.mxu2 %v2453_v57  ;;  %v3301_v20 = vld [vmem:[#allocation5 + $0x104] sm:$0xf0]  ;;  %v2492_v21 = vld [vmem:[#allocation5 + $0x180] sm:$0xf]  ;;  %v2612_v25 = vld [vmem:[#allocation5 + $0x270] sm:$0xf]  ;;  %v2373_v28 = vor.u32 %v3287_v15, %v2372_v14 }
  0x3b   :  { %818 = vmatpush.bf16.msra.mxu3 %v2517_v58  ;;  %v3317_v22 = vld [vmem:[#allocation5 + $0x184] sm:$0xf0]  ;;  %v3347_v26 = vld [vmem:[#allocation5 + $0x274] sm:$0xf0]  ;;  %v3282_v27 = vld [vmem:[#allocation5 + $0x74] sm:$0xf]  ;;  %v2429_v39 = vor.u32 %v3301_v20, %v2428_v19 }
  0x3c   :  { %790 = vmatpush.bf16.msra.mxu1 %v2389_v62  ;;  %v2358_v29 = vld [vmem:[#allocation5 + $0x78] sm:$0xf0]  ;;  %v2364_v30 = vld [vmem:[#allocation5 + $0x80] sm:$0xf]  ;;  %v3285_v31 = vld [vmem:[#allocation5 + $0x84] sm:$0xf0]  ;;  %v2493_v40 = vor.u32 %v3317_v22, %v2492_v21  ;;  %v2613_v44 = vor.u32 %v3347_v26, %v2612_v25 }
  0x3d   :  { %777 = vmatpush.bf16.msra.mxu0 %v2317_v4  ;;  %v155_v32 = vld [vmem:[#allocation2 + $0x10] sm:$0xff]  ;;  %v162_v33 = vld [vmem:[#allocation2 + $0x48] sm:$0xff]  ;;  %v2676_v34 = vld [vmem:[#allocation5 + $0x2f0] sm:$0xf]  ;;  %v2361_v45 = vor.u32 %v3282_v27, %v2358_v29  ;;  %v2365_v49 = vor.u32 %v3285_v31, %v2364_v30  ;;  %vm768_vm0 = vcmask 130048   ;;  %s2281_s10 = sshll.u32 %s3981_s9, 4  ;;  %s2282_s10 = int_to_ptr.hbm [resolvable:$true] %s2281_s10 }
  0x3e   :  { %805 = vmatpush.bf16.msra.mxu2 %v2445_v6  ;;  %v3363_v36 = vld [vmem:[#allocation5 + $0x2f4] sm:$0xf0]  ;;  %v2684_v37 = vld [vmem:[#allocation5 + $0x300] sm:$0xf]  ;;  %v3365_v38 = vld [vmem:[#allocation5 + $0x304] sm:$0xf0]  ;;  %v3906_v54 = vpack.c.bf16 %v162_v33, %v155_v32 }
  0x3f   :  { %819 = vmatpush.bf16.msra.mxu3 %v2509_v7  ;;  %v3298_v41 = vld [vmem:[#allocation5 + $0xf4] sm:$0xf]  ;;  %v2422_v42 = vld [vmem:[#allocation5 + $0xf8] sm:$0xf0]  ;;  %v160_v46 = vld [vmem:[#allocation2 + $0x38] sm:$0xff]  ;;  %v2685_v50 = vor.u32 %v3365_v38, %v2684_v37  ;;  %v2677_v55 = vor.u32 %v3363_v36, %v2676_v34 }
  0x40   :  { %791 = vmatpush.bf16.msra.mxu1 %v2381_v11  ;;  %v153_v43 = vld [vmem:[#allocation2] sm:$0xff]  ;;  %v156_v47 = vld [vmem:[#allocation2 + $0x18] sm:$0xff]  ;;  %v163_v48 = vld [vmem:[#allocation2 + $0x50] sm:$0xff]  ;;  %v2425_v59 = vor.u32 %v3298_v41, %v2422_v42 }
  0x41   :  { %778 = vmatpush.bf16.msra.mxu0 %v2309_v18  ;;  %v2604_v51 = vld [vmem:[#allocation5 + $0x260] sm:$0xf]  ;;  %v3345_v52 = vld [vmem:[#allocation5 + $0x264] sm:$0xf0]  ;;  %v3280_v53 = vld [vmem:[#allocation5 + $0x64] sm:$0xf]  ;;  %v3908_v60 = vpack.c.bf16 %v160_v46, %v153_v43  ;;  %v3910_v63 = vpack.c.bf16 %v163_v48, %v156_v47 }
  0x42   :  { %806 = vmatpush.bf16.msra.mxu2 %v2437_v23  ;;  %v2350_v56 = vld [vmem:[#allocation5 + $0x68] sm:$0xf0]  ;;  %v154_v57 = vld [vmem:[#allocation2 + $0x8] sm:$0xff]  ;;  %v161_v58 = vld [vmem:[#allocation2 + $0x40] sm:$0xff]  ;;  %v2605_v0 = vor.u32 %v3345_v52, %v2604_v51 }
  0x43   :  { %820 = vmatpush.bf16.msra.mxu3 %v2501_v24  ;;  %v2668_v61 = vld [vmem:[#allocation5 + $0x2e0] sm:$0xf]  ;;  %v3361_v62 = vld [vmem:[#allocation5 + $0x2e4] sm:$0xf0]  ;;  %v3296_v1 = vld [vmem:[#allocation5 + $0xe4] sm:$0xf]  ;;  %v2353_v3 = vor.u32 %v3280_v53, %v2350_v56  ;;  %v3912_v4 = vpack.c.bf16 %v161_v58, %v154_v57 }
  0x44   :  { %792 = vmatpush.bf16.msra.mxu1 %v2373_v28  ;;  %v2414_v2 = vld [vmem:[#allocation5 + $0xe8] sm:$0xf0]  ;;  %v2596_v5 = vld [vmem:[#allocation5 + $0x250] sm:$0xf]  ;;  %v3343_v6 = vld [vmem:[#allocation5 + $0x254] sm:$0xf0]  ;;  %v2669_v7 = vor.u32 %v3361_v62, %v2668_v61 }
  0x45   :  { %779 = vmatpush.bf16.msra.mxu0 %v2301_v35  ;;  %v3278_v8 = vld [vmem:[#allocation5 + $0x54] sm:$0xf]  ;;  %v2342_v9 = vld [vmem:[#allocation5 + $0x58] sm:$0xf0]  ;;  %v2417_v10 = vor.u32 %v3296_v1, %v2414_v2  ;;  %v2660_v11 = vld [vmem:[#allocation5 + $0x2d0] sm:$0xf]  ;;  %v2597_v13 = vor.u32 %v3343_v6, %v2596_v5 }
  0x46   :  { %807 = vmatpush.bf16.msra.mxu2 %v2429_v39  ;;  %v3359_v12 = vld [vmem:[#allocation5 + $0x2d4] sm:$0xf0]  ;;  %v3294_v14 = vld [vmem:[#allocation5 + $0xd4] sm:$0xf]  ;;  %v2406_v15 = vld [vmem:[#allocation5 + $0xd8] sm:$0xf0]  ;;  %v2345_v16 = vor.u32 %v3278_v8, %v2342_v9 }
  0x47   :  { %821 = vmatpush.bf16.msra.mxu3 %v2493_v40  ;;  %v2588_v17 = vld [vmem:[#allocation5 + $0x240] sm:$0xf]  ;;  %v3341_v18 = vld [vmem:[#allocation5 + $0x244] sm:$0xf0]  ;;  %v2661_v19 = vor.u32 %v3359_v12, %v2660_v11  ;;  %v3276_v20 = vld [vmem:[#allocation5 + $0x44] sm:$0xf]  ;;  %v2409_v22 = vor.u32 %v3294_v14, %v2406_v15 }
  0x48   :  { %793 = vmatpush.bf16.msra.mxu1 %v2365_v49  ;;  %780 = vmatmul.bf16.vlgmr.msra.gmra.mxu0 %v3908_v60  ;;  %v2334_v21 = vld [vmem:[#allocation5 + $0x48] sm:$0xf0]  ;;  %v2652_v23 = vld [vmem:[#allocation5 + $0x2c0] sm:$0xf]  ;;  %v3357_v24 = vld [vmem:[#allocation5 + $0x2c4] sm:$0xf0]  ;;  %v2589_v25 = vor.u32 %v3341_v18, %v2588_v17 }
  0x49   :  { %828 = vmatpush.bf16.msrb.mxu0 %v2613_v44  ;;  %808 = vmatmul.bf16.vlgmr.msra.gmra.mxu2 %v3906_v54  ;;  %v3292_v26 = vld [vmem:[#allocation5 + $0xc4] sm:$0xf]  ;;  %v2398_v27 = vld [vmem:[#allocation5 + $0xc8] sm:$0xf0]  ;;  %v2337_v28 = vor.u32 %v3276_v20, %v2334_v21  ;;  %v2580_v29 = vld [vmem:[#allocation5 + $0x230] sm:$0xf]  ;;  %v2653_v31 = vor.u32 %v3357_v24, %v2652_v23 }
  0x4a   :  { %863 = vmatpush.bf16.msrb.mxu2 %v2685_v50  ;;  %822 = vmatmul.bf16.vlgmr.msra.gmra.mxu3 %v3910_v63  ;;  %v3339_v30 = vld [vmem:[#allocation5 + $0x234] sm:$0xf0]  ;;  %v3274_v32 = vld [vmem:[#allocation5 + $0x34] sm:$0xf]  ;;  %v2326_v33 = vld [vmem:[#allocation5 + $0x38] sm:$0xf0]  ;;  %v2401_v35 = vor.u32 %v3292_v26, %v2398_v27 }
  0x4b   :  { %870 = vmatpush.bf16.msrb.mxu3 %v2361_v45  ;;  %794 = vmatmul.bf16.vlgmr.msra.gmra.mxu1 %v3912_v4  ;;  %v2644_v34 = vld [vmem:[#allocation5 + $0x2b0] sm:$0xf]  ;;  %v3355_v36 = vld [vmem:[#allocation5 + $0x2b4] sm:$0xf0]  ;;  %v159_v37 = vld [vmem:[#allocation2 + $0x30] sm:$0xff]  ;;  %v2581_v39 = vor.u32 %v3339_v30, %v2580_v29  ;;  %v2329_v42 = vor.u32 %v3274_v32, %v2326_v33 }
  0x4c   :  { %842 = vmatpush.bf16.msrb.mxu1 %v2677_v55  ;;  %v166_v38 = vld [vmem:[#allocation2 + $0x68] sm:$0xff]  ;;  %v3290_v40 = vld [vmem:[#allocation5 + $0xb4] sm:$0xf]  ;;  %v2572_v43 = vld [vmem:[#allocation5 + $0x220] sm:$0xf]  ;;  %v2645_v45 = vor.u32 %v3355_v36, %v2644_v34 }
  0x4d   :  { %829 = vmatpush.bf16.msrb.mxu0 %v2605_v0  ;;  %v2390_v41 = vld [vmem:[#allocation5 + $0xb8] sm:$0xf0]  ;;  %v3337_v44 = vld [vmem:[#allocation5 + $0x224] sm:$0xf0]  ;;  %v3272_v46 = vld [vmem:[#allocation5 + $0x24] sm:$0xf]  ;;  %v3918_v48 = vpack.c.bf16 %v166_v38, %v159_v37 }
  0x4e   :  { %884 = vmatpush.bf16.msra.mxu2 %v2425_v59  ;;  %v2318_v47 = vld [vmem:[#allocation5 + $0x28] sm:$0xf0]  ;;  %v2393_v49 = vor.u32 %v3290_v40, %v2390_v41  ;;  %v2636_v50 = vld [vmem:[#allocation5 + $0x2a0] sm:$0xf]  ;;  %v3353_v51 = vld [vmem:[#allocation5 + $0x2a4] sm:$0xf0]  ;;  %v2573_v52 = vor.u32 %v3337_v44, %v2572_v43 }
  0x4f   :  { %871 = vmatpush.bf16.msrb.mxu3 %v2353_v3  ;;  %v3288_v53 = vld [vmem:[#allocation5 + $0xa4] sm:$0xf]  ;;  %v2382_v55 = vld [vmem:[#allocation5 + $0xa8] sm:$0xf0]  ;;  %v2321_v56 = vor.u32 %v3272_v46, %v2318_v47  ;;  %v2564_v57 = vld [vmem:[#allocation5 + $0x210] sm:$0xf]  ;;  %v2637_v61 = vor.u32 %v3353_v51, %v2636_v50 }
  0x50   :  { %843 = vmatpush.bf16.msrb.mxu1 %v2669_v7  ;;  %v3335_v58 = vld [vmem:[#allocation5 + $0x214] sm:$0xf0]  ;;  %v3270_v59 = vld [vmem:[#allocation5 + $0x14] sm:$0xf]  ;;  %v2310_v62 = vld [vmem:[#allocation5 + $0x18] sm:$0xf0]  ;;  %v2385_v2 = vor.u32 %v3288_v53, %v2382_v55 }
  0x51   :  { %830 = vmatpush.bf16.msrb.mxu0 %v2597_v13  ;;  %v2628_v0 = vld [vmem:[#allocation5 + $0x290] sm:$0xf]  ;;  %v3351_v1 = vld [vmem:[#allocation5 + $0x294] sm:$0xf0]  ;;  %v3286_v3 = vld [vmem:[#allocation5 + $0x94] sm:$0xf]  ;;  %v2565_v7 = vor.u32 %v3335_v58, %v2564_v57  ;;  %v2313_v11 = vor.u32 %v3270_v59, %v2310_v62 }
  0x52   :  { %885 = vmatpush.bf16.msra.mxu2 %v2417_v10  ;;  %v2374_v5 = vld [vmem:[#allocation5 + $0x98] sm:$0xf0]  ;;  %v2556_v6 = vld [vmem:[#allocation5 + $0x200] sm:$0xf]  ;;  %v3333_v8 = vld [vmem:[#allocation5 + $0x204] sm:$0xf0]  ;;  %v2629_v15 = vor.u32 %v3351_v1, %v2628_v0 }
  0x53   :  { %872 = vmatpush.bf16.msrb.mxu3 %v2345_v16  ;;  %v3268_v9 = vld [vmem:[#allocation5 + $0x4] sm:$0xf]  ;;  %v2302_v10 = vld [vmem:[#allocation5 + $0x8] sm:$0xf0]  ;;  %v3314_v12 = vld [vmem:[#allocation5 + $0x174] sm:$0xf]  ;;  %v2557_v23 = vor.u32 %v3333_v8, %v2556_v6 }
  0x54   :  { %844 = vmatpush.bf16.msrb.mxu1 %v2661_v19  ;;  %v2486_v13 = vld [vmem:[#allocation5 + $0x178] sm:$0xf0]  ;;  %v3346_v14 = vld [vmem:[#allocation5 + $0x274] sm:$0xf]  ;;  %v2620_v17 = vld [vmem:[#allocation5 + $0x280] sm:$0xf]  ;;  %v2377_v19 = vor.u32 %v3286_v3, %v2374_v5  ;;  %v2305_v27 = vor.u32 %v3268_v9, %v2302_v10 }
  0x55   :  { %831 = vmatpush.bf16.msrb.mxu0 %v2589_v25  ;;  %v2614_v16 = vld [vmem:[#allocation5 + $0x278] sm:$0xf0]  ;;  %v3349_v18 = vld [vmem:[#allocation5 + $0x284] sm:$0xf0]  ;;  %v157_v20 = vld [vmem:[#allocation2 + $0x20] sm:$0xff] }
  0x56   :  { %886 = vmatpush.bf16.msra.mxu2 %v2409_v22  ;;  %v164_v21 = vld [vmem:[#allocation2 + $0x58] sm:$0xff]  ;;  %v3284_v22 = vld [vmem:[#allocation5 + $0x84] sm:$0xf]  ;;  %v3330_v25 = vld [vmem:[#allocation5 + $0x1f4] sm:$0xf]  ;;  %v2617_v32 = vor.u32 %v3346_v14, %v2614_v16  ;;  %v2621_v33 = vor.u32 %v3349_v18, %v2620_v17 }
  0x57   :  { %873 = vmatpush.bf16.msrb.mxu3 %v2337_v28  ;;  %v2366_v24 = vld [vmem:[#allocation5 + $0x88] sm:$0xf0]  ;;  %v2550_v26 = vld [vmem:[#allocation5 + $0x1f8] sm:$0xf0]  ;;  %v2489_v28 = vor.u32 %v3314_v12, %v2486_v13  ;;  %v3362_v29 = vld [vmem:[#allocation5 + $0x2f4] sm:$0xf]  ;;  %v3922_v37 = vpack.c.bf16 %v164_v21, %v157_v20 }
  0x58   :  { %845 = vmatpush.bf16.msrb.mxu1 %v2653_v31  ;;  %v2678_v30 = vld [vmem:[#allocation5 + $0x2f8] sm:$0xf0]  ;;  %v165_v34 = vld [vmem:[#allocation2 + $0x60] sm:$0xff]  ;;  %v2478_v36 = vld [vmem:[#allocation5 + $0x168] sm:$0xf0]  ;;  %v2369_v38 = vor.u32 %v3284_v22, %v2366_v24  ;;  %v2553_v41 = vor.u32 %v3330_v25, %v2550_v26 }
  0x59   :  { %832 = vmatpush.bf16.msrb.mxu0 %v2581_v39  ;;  %2690 = vmatmul.msk.bf16.vlgmr.msrb.gmra.mxu2 %vm768_vm0, %v3918_v48  ;;  %v158_v31 = vld [vmem:[#allocation2 + $0x28] sm:$0xff]  ;;  %v3344_v39 = vld [vmem:[#allocation5 + $0x264] sm:$0xf]  ;;  %v2606_v40 = vld [vmem:[#allocation5 + $0x268] sm:$0xf0] }
  0x5a   :  { %887 = vmatpush.bf16.msra.mxu2 %v2401_v35  ;;  %v3312_v35 = vld [vmem:[#allocation5 + $0x164] sm:$0xf]  ;;  %v3924_v44 = vpack.c.bf16 %v165_v34, %v158_v31  ;;  %v2542_v46 = vld [vmem:[#allocation5 + $0x1e8] sm:$0xf0]  ;;  %v2609_v50 = vor.u32 %v3344_v39, %v2606_v40  ;;  %v3310_v51 = vld [vmem:[#allocation5 + $0x154] sm:$0xf] }
  0x5b   :  { %874 = vmatpush.bf16.msrb.mxu3 %v2329_v42  ;;  %v2681_v42 = vor.u32 %v3362_v29, %v2678_v30  ;;  %v3328_v43 = vld [vmem:[#allocation5 + $0x1e4] sm:$0xf]  ;;  %v3342_v53 = vld [vmem:[#allocation5 + $0x254] sm:$0xf]  ;;  %v2598_v55 = vld [vmem:[#allocation5 + $0x258] sm:$0xf0] }
  0x5c   :  { %846 = vmatpush.bf16.msrb.mxu1 %v2645_v45  ;;  %v2481_v45 = vor.u32 %v3312_v35, %v2478_v36  ;;  %v3360_v47 = vld [vmem:[#allocation5 + $0x2e4] sm:$0xf]  ;;  %v3326_v58 = vld [vmem:[#allocation5 + $0x1d4] sm:$0xf]  ;;  %v2662_v0 = vld [vmem:[#allocation5 + $0x2d8] sm:$0xf0]  ;;  %v2601_v1 = vor.u32 %v3342_v53, %v2598_v55 }
  0x5d   :  { %833 = vmatpush.bf16.msrb.mxu0 %v2573_v52  ;;  %v2470_v52 = vld [vmem:[#allocation5 + $0x158] sm:$0xf0]  ;;  %v3358_v62 = vld [vmem:[#allocation5 + $0x2d4] sm:$0xf]  ;;  %v2462_v3 = vld [vmem:[#allocation5 + $0x148] sm:$0xf0] }
  0x5e   :  { %888 = vmatpush.bf16.msra.mxu2 %v2393_v49  ;;  %v2670_v49 = vld [vmem:[#allocation5 + $0x2e8] sm:$0xf0]  ;;  %v2473_v59 = vor.u32 %v3310_v51, %v2470_v52  ;;  %v3340_v5 = vld [vmem:[#allocation5 + $0x244] sm:$0xf]  ;;  %v2665_v8 = vor.u32 %v3358_v62, %v2662_v0  ;;  %v2454_v16 = vld [vmem:[#allocation5 + $0x138] sm:$0xf0] }
  0x5f   :  { %875 = vmatpush.bf16.msrb.mxu3 %v2321_v56  ;;  %v2545_v56 = vor.u32 %v3328_v43, %v2542_v46  ;;  %v2673_v57 = vor.u32 %v3360_v47, %v2670_v49  ;;  %v2590_v6 = vld [vmem:[#allocation5 + $0x248] sm:$0xf0]  ;;  %v3324_v9 = vld [vmem:[#allocation5 + $0x1c4] sm:$0xf]  ;;  %v3338_v17 = vld [vmem:[#allocation5 + $0x234] sm:$0xf] }
  0x60   :  { %847 = vmatpush.bf16.msrb.mxu1 %v2637_v61  ;;  %v2534_v61 = vld [vmem:[#allocation5 + $0x1d8] sm:$0xf0]  ;;  %v2526_v10 = vld [vmem:[#allocation5 + $0x1c8] sm:$0xf0]  ;;  %v3356_v12 = vld [vmem:[#allocation5 + $0x2c4] sm:$0xf]  ;;  %v2593_v14 = vor.u32 %v3340_v5, %v2590_v6 }
  0x61   :  { %834 = vmatpush.bf16.msrb.mxu0 %v2565_v7  ;;  %v2537_v7 = vor.u32 %v3326_v58, %v2534_v61  ;;  %v2654_v13 = vld [vmem:[#allocation5 + $0x2c8] sm:$0xf0]  ;;  %v2529_v18 = vor.u32 %v3324_v9, %v2526_v10  ;;  %v2518_v21 = vld [vmem:[#allocation5 + $0x1b8] sm:$0xf0]  ;;  %v3354_v22 = vld [vmem:[#allocation5 + $0x2b4] sm:$0xf] }
  0x62   :  { %889 = vmatpush.bf16.msra.mxu2 %v2385_v2  ;;  %v3308_v2 = vld [vmem:[#allocation5 + $0x144] sm:$0xf]  ;;  %v2446_v26 = vld [vmem:[#allocation5 + $0x128] sm:$0xf0]  ;;  %v2438_v39 = vld [vmem:[#allocation5 + $0x118] sm:$0xf0] }
  0x63   :  { %876 = vmatpush.bf16.msrb.mxu3 %v2313_v11  ;;  %v2465_v11 = vor.u32 %v3308_v2, %v2462_v3  ;;  %v3304_v25 = vld [vmem:[#allocation5 + $0x124] sm:$0xf]  ;;  %v2638_v35 = vld [vmem:[#allocation5 + $0x2a8] sm:$0xf0]  ;;  %v3334_v40 = vld [vmem:[#allocation5 + $0x214] sm:$0xf] }
  0x64   :  { %848 = vmatpush.bf16.msrb.mxu1 %v2629_v15  ;;  %v3306_v15 = vld [vmem:[#allocation5 + $0x134] sm:$0xf]  ;;  %v3320_v31 = vld [vmem:[#allocation5 + $0x1a4] sm:$0xf]  ;;  %v2502_v47 = vld [vmem:[#allocation5 + $0x198] sm:$0xf0] }
  0x65   :  { %835 = vmatpush.bf16.msrb.mxu0 %v2557_v23  ;;  %v2457_v20 = vor.u32 %v3306_v15, %v2454_v16  ;;  %v2646_v23 = vld [vmem:[#allocation5 + $0x2b8] sm:$0xf0]  ;;  %v3352_v34 = vld [vmem:[#allocation5 + $0x2a4] sm:$0xf]  ;;  %v3350_v49 = vld [vmem:[#allocation5 + $0x294] sm:$0xf] }
  0x66   :  { %890 = vmatpush.bf16.msra.mxu2 %v2377_v19  ;;  %v3322_v19 = vld [vmem:[#allocation5 + $0x1b4] sm:$0xf]  ;;  %v2649_v30 = vor.u32 %v3354_v22, %v2646_v23  ;;  %v2641_v43 = vor.u32 %v3352_v34, %v2638_v35  ;;  %v3300_v52 = vld [vmem:[#allocation5 + $0x104] sm:$0xf]  ;;  %v2430_v53 = vld [vmem:[#allocation5 + $0x108] sm:$0xf0] }
  0x67   :  { %877 = vmatpush.bf16.msrb.mxu3 %v2305_v27  ;;  %v3336_v27 = vld [vmem:[#allocation5 + $0x224] sm:$0xf]  ;;  %v2521_v29 = vor.u32 %v3322_v19, %v2518_v21  ;;  %v2686_v58 = vld [vmem:[#allocation5 + $0x308] sm:$0xf0]  ;;  %v2433_v62 = vor.u32 %v3300_v52, %v2430_v53  ;;  %v3366_v15 = vld [vmem:[#allocation8] sm:$0xff] }
  0x68   :  { %849 = vmatpush.bf16.msrb.mxu1 %v2621_v33  ;;  %836 = vmatmul.bf16.vlgmr.msrb.gmra.mxu0 %v3922_v37  ;;  %v2510_v33 = vld [vmem:[#allocation5 + $0x1a8] sm:$0xf0]  ;;  %v3332_v55 = vld [vmem:[#allocation5 + $0x204] sm:$0xf]  ;;  %v3375_v53 = vld [vmem:[#allocation8 + $0x48] sm:$0xff] }
  0x69   :  { %898 = vmatpush.bf16.msra.mxu0 %v2489_v28  ;;  %v2574_v28 = vld [vmem:[#allocation5 + $0x228] sm:$0xf0]  ;;  %v3316_v0 = vld [vmem:[#allocation5 + $0x184] sm:$0xf] }
  0x6a   :  { %891 = vmatpush.bf16.msra.mxu2 %v2369_v38  ;;  %878 = vmatmul.bf16.vlgmr.msrb.gmra.mxu3 %v3908_v60  ;;  %v2657_v60 = vor.u32 %v3356_v12, %v2654_v13  ;;  %v2577_v36 = vor.u32 %v3336_v27, %v2574_v28  ;;  %v3302_v38 = vld [vmem:[#allocation5 + $0x114] sm:$0xf]  ;;  %v3348_v3 = vld [vmem:[#allocation5 + $0x284] sm:$0xf]  ;;  %v2622_v5 = vld [vmem:[#allocation5 + $0x288] sm:$0xf0] }
  0x6b   :  { %926 = vmatpush.bf16.msra.mxu3 %v2617_v32  ;;  %850 = vmatmul.bf16.vlgmr.msrb.gmra.mxu1 %v3924_v44  ;;  %v2449_v32 = vor.u32 %v3304_v25, %v2446_v26  ;;  %v2441_v46 = vor.u32 %v3302_v38, %v2438_v39  ;;  %v3373_v9 = vld [vmem:[#allocation8 + $0x38] sm:$0xff]  ;;  %v3372_v10 = vld [vmem:[#allocation8 + $0x30] sm:$0xff]  ;;  %v3370_v12 = vld [vmem:[#allocation8 + $0x20] sm:$0xff] }
  0x6c   :  { %912 = vmatpush.bf16.msra.mxu1 %v2553_v41  ;;  %v2566_v41 = vld [vmem:[#allocation5 + $0x218] sm:$0xf0]  ;;  %v3369_v13 = vld [vmem:[#allocation8 + $0x18] sm:$0xff]  ;;  %v3380_v27 = vld [vmem:[#allocation8 + $0x70] sm:$0xff] }
  0x6d   :  { %899 = vmatpush.bf16.msra.mxu0 %v2481_v45  ;;  %892 = vmatmul.bf16.vlgmr.msra.gmra.mxu2 %v3912_v4  ;;  %v2582_v4 = vld [vmem:[#allocation5 + $0x238] sm:$0xf0]  ;;  %v3318_v45 = vld [vmem:[#allocation5 + $0x194] sm:$0xf]  ;;  %v2569_v51 = vor.u32 %v3334_v40, %v2566_v41  ;;  %v3381_v22 = vld [vmem:[#allocation8 + $0x78] sm:$0xff] }
  0x6e   :  { %940 = vmatpush.bf16.msrb.mxu2 %v2681_v42  ;;  %v2585_v24 = vor.u32 %v3338_v17, %v2582_v4  ;;  %v2513_v42 = vor.u32 %v3320_v31, %v2510_v33  ;;  %v3379_v33 = vld [vmem:[#allocation8 + $0x68] sm:$0xff]  ;;  %v3378_v38 = vld [vmem:[#allocation8 + $0x60] sm:$0xff] }
  0x6f   :  { %927 = vmatpush.bf16.msra.mxu3 %v2609_v50  ;;  %v2630_v50 = vld [vmem:[#allocation5 + $0x298] sm:$0xf0] }
  0x70   :  { %913 = vmatpush.bf16.msra.mxu1 %v2545_v56  ;;  %v2558_v56 = vld [vmem:[#allocation5 + $0x208] sm:$0xf0]  ;;  %v2633_v61 = vor.u32 %v3350_v49, %v2630_v50  ;;  %v3376_v50 = vld [vmem:[#allocation8 + $0x50] sm:$0xff] }
  0x71   :  { %900 = vmatpush.bf16.msra.mxu0 %v2473_v59  ;;  %v2505_v59 = vor.u32 %v3318_v45, %v2502_v47  ;;  %v2561_v2 = vor.u32 %v3332_v55, %v2558_v56  ;;  %v3377_v45 = vld [vmem:[#allocation8 + $0x58] sm:$0xff]  ;;  %v3374_v56 = vld [vmem:[#allocation8 + $0x40] sm:$0xff] }
  0x72   :  { %941 = vmatpush.bf16.msrb.mxu2 %v2673_v57  ;;  %v3364_v57 = vld [vmem:[#allocation5 + $0x304] sm:$0xf] }
  0x73   :  { %928 = vmatpush.bf16.msra.mxu3 %v2601_v1  ;;  %v2494_v1 = vld [vmem:[#allocation5 + $0x188] sm:$0xf0]  ;;  %v2689_v6 = vor.u32 %v3364_v57, %v2686_v58 }
  0x74   :  { %914 = vmatpush.bf16.msra.mxu1 %v2537_v7  ;;  %v2497_v7 = vor.u32 %v3316_v0, %v2494_v1 }
  0x75   :  { %901 = vmatpush.bf16.msra.mxu0 %v2465_v11  ;;  %v3371_v11 = vld [vmem:[#allocation8 + $0x28] sm:$0xff] }
  0x76   :  { %942 = vmatpush.bf16.msrb.mxu2 %v2665_v8  ;;  %v2625_v8 = vor.u32 %v3348_v3, %v2622_v5 }
  0x77   :  { %929 = vmatpush.bf16.msra.mxu3 %v2593_v14 }
  0x78   :  { %915 = vmatpush.bf16.msra.mxu1 %v2529_v18 }
  0x79   :  { %902 = vmatpush.bf16.msra.mxu0 %v2457_v20 }
  0x7a   :  { %943 = vmatpush.bf16.msrb.mxu2 %v2657_v60 }
  0x7b   :  { %930 = vmatpush.bf16.msra.mxu3 %v2585_v24 }
  0x7c   :  { %916 = vmatpush.bf16.msra.mxu1 %v2521_v29 }
  0x7d   :  { %903 = vmatpush.bf16.msra.mxu0 %v2449_v32 }
  0x7e   :  { %944 = vmatpush.bf16.msrb.mxu2 %v2649_v30 }
  0x7f   :  { %931 = vmatpush.bf16.msra.mxu3 %v2577_v36 }
  0x80   :  { %917 = vmatpush.bf16.msra.mxu1 %v2513_v42 }
  0x81   :  { %904 = vmatpush.bf16.msra.mxu0 %v2441_v46 }
  0x82   :  { %945 = vmatpush.bf16.msrb.mxu2 %v2641_v43 }
  0x83   :  { %932 = vmatpush.bf16.msra.mxu3 %v2569_v51 }
  0x84   :  { %918 = vmatpush.bf16.msra.mxu1 %v2505_v59 }
  0x85   :  { %905 = vmatpush.bf16.msra.mxu0 %v2433_v62 }
  0x86   :  { %946 = vmatpush.bf16.msrb.mxu2 %v2633_v61 }
  0x87   :  { %933 = vmatpush.bf16.msra.mxu3 %v2561_v2 }
  0x88   :  { %919 = vmatpush.bf16.msra.mxu1 %v2497_v7  ;;  %906 = vmatmul.bf16.vlgmr.msra.gmra.mxu0 %v3906_v54  ;;  %v3368_v54 = vld [vmem:[#allocation8 + $0x10] sm:$0xff] }
  0x89   :  { %961 = vmatpush.bf16.msrb.mxu0 %v2689_v6 }
  0x8a   :  { %934 = vmatmul.bf16.vlgmr.msra.gmra.mxu3 %v3922_v37  ;;  %947 = vmatpush.bf16.msrb.mxu2 %v2625_v8  ;;  %v3367_v37 = vld [vmem:[#allocation8 + $0x8] sm:$0xff] }
  0x8b   :  { %920 = vmatmul.bf16.vlgmr.msra.gmra.mxu1 %v3910_v63  ;;  %v272_v63 = vld [vmem:[#allocation7] sm:$0x3]  ;;  %1120 = vmatpush.bf16.msrb.mxu3 %v3381_v22 }
  0x8c   :  { %1106 = vmatpush.bf16.msrb.mxu1 %v3373_v9  ;;  %v275_v57 = vperm.slane %v272_v63, 1 }
  0x8d   :  { %948 = vmatmul.bf16.vlgmr.msrb.gmra.mxu2 %v3924_v44 }
  0x8f   :  { %1121 = vmatpush.bf16.msrb.mxu3 %v3380_v27  ;;  %v3394_v27 = vld [vmem:[#allocation11 + $0x64] sm:$0xf] }
  0x90   :  { %1107 = vmatpush.bf16.msrb.mxu1 %v3372_v10 }
  0x93   :  { %1122 = vmatpush.bf16.msrb.mxu3 %v3379_v33  ;;  %v3392_v33 = vld [vmem:[#allocation11 + $0x54] sm:$0xf] }
  0x94   :  { %1108 = vmatpush.bf16.msrb.mxu1 %v3371_v11 }
  0x97   :  { %1123 = vmatpush.bf16.msrb.mxu3 %v3378_v38  ;;  %v2790_v38 = vld [vmem:[#allocation11 + $0x40] sm:$0xf] }
  0x98   :  { %2691 = vmatmul.msk.bf16.vlgmr.msrb.gmra.mxu0 %vm768_vm0, %v3918_v48  ;;  %1109 = vmatpush.bf16.msrb.mxu1 %v3370_v12  ;;  %v274_v48 = vperm.slane %v272_v63, 0 }
  0x9b   :  { %1124 = vmatpush.bf16.msrb.mxu3 %v3377_v45  ;;  %v2782_v45 = vld [vmem:[#allocation11 + $0x30] sm:$0xf] }
  0x9c   :  { %1110 = vmatpush.bf16.msrb.mxu1 %v3369_v13 }
  0x9f   :  { %1125 = vmatpush.bf16.msrb.mxu3 %v3376_v50  ;;  %v2784_v50 = vld [vmem:[#allocation11 + $0x38] sm:$0xf0] }
  0xa0   :  { %1111 = vmatpush.bf16.msrb.mxu1 %v3368_v54 }
  0xa3   :  { %1126 = vmatpush.bf16.msrb.mxu3 %v3375_v53  ;;  %v3387_v53 = vld [vmem:[#allocation11 + $0x24] sm:$0xf0] }
  0xa4   :  { %1112 = vmatpush.bf16.msrb.mxu1 %v3367_v37 }
  0xa7   :  { %1127 = vmatpush.bf16.msrb.mxu3 %v3374_v56 }
  0xa8   :  { %1113 = vmatpush.bf16.msrb.mxu1 %v3366_v15 }
  0xc5   :  { %v781_v14 = vpop.f32.mrf.mxu0 }
  0xc6   :  { %v782_v17 = vadd.f32 %v781_v14, %v274_v48 }
  0xc8   :  { %v795_v16 = vpop.f32.mrf.mxu1 }
  0xc9   :  { %v796_v60 = vadd.f32 %v795_v16, %v782_v17 }
  0xcc   :  { %v809_v44 = vpop.f32.mrf.mxu2 }
  0xcd   :  { %v783_v4 = vpop.f32.mrf.mxu0  ;;  %v823_v19 = vpop.f32.mrf.mxu3  ;;  %v810_v23 = vadd.f32 %v809_v44, %v796_v60 }
  0xce   :  { %v784_v21 = vadd.f32 %v783_v4, %v274_v48 }
  0xcf   :  { %v824_v28 = vadd.f32 %v823_v19, %v810_v23  ;;  %v2814_v19 = vld [vmem:[#allocation11 + $0x70] sm:$0xf]  ;;  %v2816_v23 = vld [vmem:[#allocation11 + $0x78] sm:$0xf0] }
  0xd0   :  { %v797_v20 = vpop.f32.mrf.mxu1 }
  0xd1   :  { %v798_v24 = vadd.f32 %v797_v20, %v784_v21  ;;  %v3397_v20 = vld [vmem:[#allocation11 + $0x74] sm:$0xf0]  ;;  %v3396_v21 = vld [vmem:[#allocation11 + $0x74] sm:$0xf] }
  0xd2   :  { %v2815_v22 = vor.u32 %v3397_v20, %v2814_v19 }
  0xd4   :  { %v811_v18 = vpop.f32.mrf.mxu2  ;;  %1239 = vmatpush.bf16.msra.mxu0 %v2815_v22  ;;  %v3436_v22 = vld [vmem:[#allocation14 + $0x130] sm:$0xf0] }
  0xd5   :  { %v812_v30 = vadd.f32 %v811_v18, %v798_v24  ;;  %v825_v32 = vpop.f32.mrf.mxu3  ;;  %v2806_v24 = vld [vmem:[#allocation11 + $0x60] sm:$0xf] }
  0xd7   :  { %v826_v34 = vadd.f32 %v825_v32, %v812_v30  ;;  %v3393_v32 = vld [vmem:[#allocation11 + $0x54] sm:$0xf0] }
  0xdc   :  { %v865_v26 = vpop.f32.mrf.mxu2 }
  0xe4   :  { %v867_v41 = vpop.f32.mrf.mxu2 }
  0xe5   :  { %v837_v25 = vpop.f32.mrf.mxu0 }
  0xe6   :  { %v838_v31 = vadd.f32 %v837_v25, %v824_v28  ;;  %v3395_v25 = vld [vmem:[#allocation11 + $0x64] sm:$0xf0]  ;;  %v2808_v28 = vld [vmem:[#allocation11 + $0x68] sm:$0xf0] }
  0xe7   :  { %v2811_v30 = vor.u32 %v3394_v27, %v2808_v28  ;;  %v3496_v28 = vld [vmem:[#allocation14 + $0x314] sm:$0xf] }
  0xe8   :  { %v851_v29 = vpop.f32.mrf.mxu1 }
  0xe9   :  { %v852_v35 = vadd.f32 %v851_v29, %v838_v31  ;;  %v2807_v29 = vor.u32 %v3395_v25, %v2806_v24  ;;  %v2798_v31 = vld [vmem:[#allocation11 + $0x50] sm:$0xf]  ;;  %v2964_v24 = vld [vmem:[#allocation14 + $0x134] sm:$0xf0] }
  0xea   :  { %v3214_v25 = vld [vmem:[#allocation14 + $0x310] sm:$0xf] }
  0xeb   :  { %v866_v42 = vadd.f32 %v865_v26, %v852_v35  ;;  %v2819_v26 = vor.u32 %v3396_v21, %v2816_v23  ;;  %1240 = vmatpush.bf16.msra.mxu0 %v2807_v29  ;;  %v2799_v35 = vor.u32 %v3393_v32, %v2798_v31  ;;  %v2962_v21 = vld [vmem:[#allocation14 + $0x118] sm:$0xf]  ;;  %v3433_v23 = vld [vmem:[#allocation14 + $0x11c] sm:$0xf]  ;;  %v3216_v29 = vld [vmem:[#allocation14 + $0x32c] sm:$0xf0] }
  0xec   :  { %v3219_v31 = vor.u32 %v3496_v28, %v3216_v29  ;;  %v2934_v32 = vld [vmem:[#allocation14 + $0xe0] sm:$0xf]  ;;  %v3401_v29 = vld [vmem:[#allocation14 + $0x18] sm:$0xf0] }
  0xed   :  { %v839_v36 = vpop.f32.mrf.mxu0  ;;  %v968_v47 = vmax.f32 %v866_v42, 0.0  ;;  %v879_v52 = vpop.f32.mrf.mxu3  ;;  %1253 = vmatpush.bf16.msra.mxu2 %v2819_v26  ;;  %v3499_v26 = vld [vmem:[#allocation14 + $0x328] sm:$0xf0]  ;;  %v2822_v28 = vld [vmem:[#allocation14] sm:$0xf] }
  0xee   :  { %v840_v39 = vadd.f32 %v839_v36, %v826_v34  ;;  %v880_v62 = vadd.f32 %v879_v52, %v275_v57  ;;  %v2800_v34 = vld [vmem:[#allocation11 + $0x58] sm:$0xf0]  ;;  %v2774_v52 = vld [vmem:[#allocation11 + $0x20] sm:$0xf]  ;;  %v3215_v27 = vor.u32 %v3499_v26, %v3214_v25 }
  0xef   :  { %v2803_v36 = vor.u32 %v3392_v33, %v2800_v34  ;;  %1241 = vmatpush.bf16.msra.mxu0 %v2799_v35  ;;  %v2775_v56 = vor.u32 %v3387_v53, %v2774_v52  ;;  %v3429_v33 = vld [vmem:[#allocation14 + $0xf8] sm:$0xf0]  ;;  %v2967_v34 = vor.u32 %v3433_v23, %v2964_v24  ;;  %v3186_v35 = vld [vmem:[#allocation14 + $0x2d8] sm:$0xf]  ;;  %v2906_v53 = vld [vmem:[#allocation14 + $0xa8] sm:$0xf] }
  0xf0   :  { %v853_v40 = vpop.f32.mrf.mxu1  ;;  %v893_v55 = vpop.f32.mrf.mxu2  ;;  %v3461_v23 = vld [vmem:[#allocation14 + $0x1fc] sm:$0xf]  ;;  %v3076_v24 = vld [vmem:[#allocation14 + $0x214] sm:$0xf0] }
  0xf1   :  { %v854_v43 = vadd.f32 %v853_v40, %v840_v39  ;;  %v894_v1 = vadd.f32 %v893_v55, %v880_v62  ;;  %1254 = vmatpush.bf16.msra.mxu2 %v2811_v30  ;;  %v3391_v39 = vld [vmem:[#allocation11 + $0x44] sm:$0xf0]  ;;  %v3390_v40 = vld [vmem:[#allocation11 + $0x44] sm:$0xf]  ;;  %v3384_v62 = vld [vmem:[#allocation11 + $0x14] sm:$0xf]  ;;  %v2963_v30 = vor.u32 %v3436_v22, %v2962_v21 }
  0xf2   :  { %v2791_v42 = vor.u32 %v3391_v39, %v2790_v38  ;;  %v3386_v55 = vld [vmem:[#allocation11 + $0x24] sm:$0xf]  ;;  %v3489_v38 = vld [vmem:[#allocation14 + $0x2dc] sm:$0xf]  ;;  %v3464_v22 = vld [vmem:[#allocation14 + $0x210] sm:$0xf0] }
  0xf3   :  { %v868_v46 = vadd.f32 %v867_v41, %v854_v43  ;;  %v2792_v41 = vld [vmem:[#allocation11 + $0x48] sm:$0xf0]  ;;  %v3426_v39 = vld [vmem:[#allocation14 + $0xe4] sm:$0xf] }
  0xf4   :  { %v2795_v43 = vor.u32 %v3390_v40, %v2792_v41  ;;  %1242 = vmatpush.bf16.msra.mxu0 %v2791_v42  ;;  %v2936_v40 = vld [vmem:[#allocation14 + $0xfc] sm:$0xf0]  ;;  %v3188_v41 = vld [vmem:[#allocation14 + $0x2f4] sm:$0xf0] }
  0xf5   :  { %v970_v49 = vmax.f32 %v868_v46, 0.0  ;;  %v881_v58 = vpop.f32.mrf.mxu3  ;;  %1255 = vmatpush.bf16.msra.mxu2 %v2803_v36  ;;  %v3389_v46 = vld [vmem:[#allocation11 + $0x34] sm:$0xf0]  ;;  %v2939_v52 = vor.u32 %v3426_v39, %v2936_v40  ;;  %v3028_v39 = vld [vmem:[#allocation14 + $0x1ac] sm:$0xf0]  ;;  %v3079_v40 = vor.u32 %v3461_v23, %v3076_v24 }
  0xf6   :  { %v882_v2 = vadd.f32 %v881_v58, %v275_v57  ;;  %v2776_v57 = vld [vmem:[#allocation11 + $0x28] sm:$0xf0]  ;;  %v3492_v36 = vld [vmem:[#allocation14 + $0x2f0] sm:$0xf0]  ;;  %v3196_v23 = vld [vmem:[#allocation14 + $0x2fc] sm:$0xf0] }
  0xf7   :  { %v972_v51 = vpack.c.bf16 %v970_v49, %v968_v47  ;;  %v3388_v47 = vld [vmem:[#allocation11 + $0x34] sm:$0xf]  ;;  %v2783_v49 = vor.u32 %v3389_v46, %v2782_v45  ;;  %v2779_v58 = vor.u32 %v3386_v55, %v2776_v57  ;;  %v3187_v42 = vor.u32 %v3492_v36, %v3186_v35  ;;  %v3158_v45 = vld [vmem:[#allocation14 + $0x2a0] sm:$0xf]  ;;  %v3422_v55 = vld [vmem:[#allocation14 + $0xc0] sm:$0xf0] }
  0xf8   :  { %v895_v61 = vpop.f32.mrf.mxu2  ;;  %v2908_v57 = vld [vmem:[#allocation14 + $0xc4] sm:$0xf0] }
  0xf9   :  { %1114 = vmatmul.bf16.vlgmr.msrb.gmra.mxu1 %v972_v51  ;;  %v896_v7 = vadd.f32 %v895_v61, %v882_v2  ;;  %1256 = vmatpush.bf16.msra.mxu2 %v2795_v43  ;;  %v2787_v51 = vor.u32 %v3388_v47, %v2784_v50  ;;  %v3385_v61 = vld [vmem:[#allocation11 + $0x14] sm:$0xf0]  ;;  %v3191_v43 = vor.u32 %v3489_v38, %v3188_v41  ;;  %v3482_v50 = vld [vmem:[#allocation14 + $0x2a4] sm:$0xf]  ;;  %v3046_v41 = vld [vmem:[#allocation14 + $0x1c0] sm:$0xf] }
  0xfa   :  { %1243 = vmatpush.bf16.msra.mxu0 %v2783_v49  ;;  %v2935_v47 = vor.u32 %v3429_v33, %v2934_v32  ;;  %v3485_v49 = vld [vmem:[#allocation14 + $0x2b8] sm:$0xf0]  ;;  %v2824_v32 = vld [vmem:[#allocation14 + $0x1c] sm:$0xf0]  ;;  %v3026_v33 = vld [vmem:[#allocation14 + $0x190] sm:$0xf] }
  0xfb   :  { %v3448_v38 = vld [vmem:[#allocation14 + $0x194] sm:$0xf] }
  0xfd   :  { %1257 = vmatpush.bf16.msra.mxu2 %v2787_v51  ;;  %v3160_v51 = vld [vmem:[#allocation14 + $0x2bc] sm:$0xf0] }
  0xfe   :  { %1244 = vmatpush.bf16.msra.mxu0 %v2775_v56  ;;  %v3419_v56 = vld [vmem:[#allocation14 + $0xac] sm:$0xf] }
 0x101   :  { %1258 = vmatpush.bf16.msra.mxu2 %v2779_v58  ;;  %v3159_v58 = vor.u32 %v3485_v49, %v3158_v45  ;;  %v3454_v45 = vld [vmem:[#allocation14 + $0x1c4] sm:$0xf] }
 0x105   :  { %v907_v59 = vpop.f32.mrf.mxu0 }
 0x106   :  { %v908_v8 = vadd.f32 %v907_v59, %v894_v1  ;;  %v2766_v59 = vld [vmem:[#allocation11 + $0x10] sm:$0xf]  ;;  %v2768_v1 = vld [vmem:[#allocation11 + $0x18] sm:$0xf0] }
 0x107   :  { %v2771_v2 = vor.u32 %v3384_v62, %v2768_v1  ;;  %v2907_v62 = vor.u32 %v3422_v55, %v2906_v53  ;;  %v3475_v1 = vld [vmem:[#allocation14 + $0x26c] sm:$0xf]  ;;  %v3504_v55 = vld [vmem:[#allocation14 + $0x354] sm:$0xf] }
 0x108   :  { %v921_v0 = vpop.f32.mrf.mxu1 }
 0x109   :  { %v922_v11 = vadd.f32 %v921_v0, %v908_v8  ;;  %v2767_v0 = vor.u32 %v3385_v61, %v2766_v59  ;;  %1259 = vmatpush.bf16.msra.mxu2 %v2771_v2  ;;  %v2760_v8 = vld [vmem:[#allocation11 + $0x8] sm:$0xf0]  ;;  %v3163_v59 = vor.u32 %v3482_v50, %v3160_v51  ;;  %v3250_v50 = vld [vmem:[#allocation14 + $0x350] sm:$0xf] }
 0x10a   :  { %v3130_v61 = vld [vmem:[#allocation14 + $0x268] sm:$0xf]  ;;  %v3507_v51 = vld [vmem:[#allocation14 + $0x368] sm:$0xf0] }
 0x10b   :  { %1245 = vmatpush.bf16.msra.mxu0 %v2767_v0  ;;  %v3478_v0 = vld [vmem:[#allocation14 + $0x280] sm:$0xf0]  ;;  %v3132_v2 = vld [vmem:[#allocation14 + $0x284] sm:$0xf0] }
 0x10d   :  { %v935_v3 = vpop.f32.mrf.mxu3  ;;  %v909_v5 = vpop.f32.mrf.mxu0 }
 0x10e   :  { %v910_v9 = vadd.f32 %v909_v5, %v896_v7  ;;  %v936_v54 = vadd.f32 %v935_v3, %v922_v11  ;;  %v2758_v3 = vld [vmem:[#allocation11] sm:$0xf]  ;;  %v3383_v5 = vld [vmem:[#allocation11 + $0x4] sm:$0xf0] }
 0x10f   :  { %v2759_v7 = vor.u32 %v3383_v5, %v2758_v3  ;;  %v3450_v11 = vld [vmem:[#allocation14 + $0x1a0] sm:$0xf0]  ;;  %v2911_v3 = vor.u32 %v3419_v56, %v2908_v57  ;;  %v2878_v5 = vld [vmem:[#allocation14 + $0x70] sm:$0xf] }
 0x110   :  { %v949_v6 = vpop.f32.mrf.mxu2  ;;  %v923_v10 = vpop.f32.mrf.mxu1  ;;  %v3252_v56 = vld [vmem:[#allocation14 + $0x36c] sm:$0xf0] }
 0x111   :  { %v924_v37 = vadd.f32 %v923_v10, %v910_v9  ;;  %v950_v44 = vadd.f32 %v949_v6, %v936_v54  ;;  %v3382_v6 = vld [vmem:[#allocation11 + $0x4] sm:$0xf]  ;;  %1246 = vmatpush.bf16.msra.mxu0 %v2759_v7  ;;  %v3018_v10 = vld [vmem:[#allocation14 + $0x188] sm:$0xf] }
 0x112   :  { %v2763_v9 = vor.u32 %v3382_v6, %v2760_v8  ;;  %v3020_v54 = vld [vmem:[#allocation14 + $0x1a4] sm:$0xf0]  ;;  %v3415_v6 = vld [vmem:[#allocation14 + $0x88] sm:$0xf0]  ;;  %v3412_v8 = vld [vmem:[#allocation14 + $0x74] sm:$0xf] }
 0x114   :  { %1260 = vmatpush.bf16.msra.mxu2 %v2763_v9  ;;  %v2880_v9 = vld [vmem:[#allocation14 + $0x8c] sm:$0xf0] }
 0x115   :  { %v937_v12 = vpop.f32.mrf.mxu3  ;;  %v963_v13 = vpop.f32.mrf.mxu0 }
 0x116   :  { %v938_v63 = vadd.f32 %v937_v12, %v924_v37  ;;  %v964_v15 = vadd.f32 %v963_v13, %v950_v44  ;;  %v3447_v12 = vld [vmem:[#allocation14 + $0x18c] sm:$0xf]  ;;  %v3019_v13 = vor.u32 %v3450_v11, %v3018_v10  ;;  %v2990_v37 = vld [vmem:[#allocation14 + $0x150] sm:$0xf]  ;;  %v3440_v44 = vld [vmem:[#allocation14 + $0x154] sm:$0xf]  ;;  %v3131_v11 = vor.u32 %v3478_v0, %v3130_v61 }
 0x117   :  { %v3527_v10 = vld [vmem:[#allocation10] ss:$0 sm:$0xff]  ;;  %v3444_v61 = vld [vmem:[#allocation14 + $0x170] sm:$0xf0] }
 0x118   :  { %v951_v14 = vpop.f32.mrf.mxu2  ;;  %v969_v4 = vmax.f32 %v964_v15, 0.0  ;;  %v2992_v15 = vld [vmem:[#allocation14 + $0x16c] sm:$0xf0]  ;;  %1993 = vmatpush.bf16.msra.mxu1 %v3019_v13  ;;  %v3441_v0 = vld [vmem:[#allocation14 + $0x15c] sm:$0xf] }
 0x119   :  { %v952_v16 = vadd.f32 %v951_v14, %v938_v63  ;;  %v3443_v63 = vld [vmem:[#allocation14 + $0x168] sm:$0xf0]  ;;  %v3023_v14 = vor.u32 %v3447_v12, %v3020_v54  ;;  %v3135_v12 = vor.u32 %v3475_v1, %v3132_v2  ;;  %v3102_v13 = vld [vmem:[#allocation14 + $0x230] sm:$0xf]  ;;  %v2879_v54 = vor.u32 %v3415_v6, %v2878_v5  ;;  %v3000_v1 = vld [vmem:[#allocation14 + $0x174] sm:$0xf0] }
 0x11a   :  { %v3255_v5 = vor.u32 %v3504_v55, %v3252_v56  ;;  %v3222_v6 = vld [vmem:[#allocation14 + $0x318] sm:$0xf]  ;;  %v3406_v56 = vld [vmem:[#allocation14 + $0x44] sm:$0xf] }
 0x11b   :  { %2021 = vmatpush.bf16.msrb.mxu0 %v3023_v14  ;;  %v3104_v14 = vld [vmem:[#allocation14 + $0x24c] sm:$0xf0] }
 0x11d   :  { %v965_v48 = vpop.f32.mrf.mxu0 }
 0x11e   :  { %v966_v17 = vadd.f32 %v965_v48, %v952_v16  ;;  %v3242_v16 = vld [vmem:[#allocation14 + $0x348] sm:$0xf]  ;;  %v2991_v48 = vor.u32 %v3443_v63, %v2990_v37  ;;  %v3471_v37 = vld [vmem:[#allocation14 + $0x248] sm:$0xf0]  ;;  %v3468_v63 = vld [vmem:[#allocation14 + $0x234] sm:$0xf] }
 0x120   :  { %v971_v18 = vmax.f32 %v966_v17, 0.0  ;;  %v3506_v17 = vld [vmem:[#allocation14 + $0x360] sm:$0xf0]  ;;  %1994 = vmatpush.bf16.msra.mxu1 %v2991_v48 }
 0x121   :  { %v3243_v19 = vor.u32 %v3506_v17, %v3242_v16  ;;  %v3408_v16 = vld [vmem:[#allocation14 + $0x50] sm:$0xf0]  ;;  %v3405_v17 = vld [vmem:[#allocation14 + $0x3c] sm:$0xf] }
 0x122   :  { %v973_v60 = vpack.c.bf16 %v971_v18, %v969_v4  ;;  %v3503_v4 = vld [vmem:[#allocation14 + $0x34c] sm:$0xf]  ;;  %v3244_v18 = vld [vmem:[#allocation14 + $0x364] sm:$0xf0] }
 0x123   :  { %v3247_v20 = vor.u32 %v3503_v4, %v3244_v18  ;;  %2007 = vmatpush.bf16.msra.mxu3 %v3243_v19  ;;  %v2852_v4 = vld [vmem:[#allocation14 + $0x54] sm:$0xf0]  ;;  %v3107_v19 = vor.u32 %v3468_v63, %v3104_v14 }
 0x124   :  { %1128 = vmatmul.bf16.vlgmr.msrb.gmra.mxu3 %v973_v60  ;;  %v2995_v60 = vor.u32 %v3440_v44, %v2992_v15  ;;  %1995 = vmatpush.bf16.msra.mxu1 %v2963_v30  ;;  %v2883_v44 = vor.u32 %v3412_v8, %v2880_v9  ;;  %v2850_v15 = vld [vmem:[#allocation14 + $0x38] sm:$0xf]  ;;  %v3398_v30 = vld [vmem:[#allocation14 + $0x4] sm:$0xf]  ;;  %v3497_v9 = vld [vmem:[#allocation14 + $0x31c] sm:$0xf] }
 0x125   :  { %2035 = vmatpush.bf16.msrb.mxu2 %v3247_v20  ;;  %v3074_v20 = vld [vmem:[#allocation14 + $0x1f8] sm:$0xf]  ;;  %v2851_v21 = vor.u32 %v3408_v16, %v2850_v15  ;;  %v2942_v16 = vld [vmem:[#allocation14 + $0xe8] sm:$0xf] }
 0x126   :  { %2022 = vmatpush.bf16.msrb.mxu0 %v2995_v60  ;;  %v3103_v60 = vor.u32 %v3471_v37, %v3102_v13  ;;  %v3075_v36 = vor.u32 %v3464_v22, %v3074_v20  ;;  %v3437_v13 = vld [vmem:[#allocation14 + $0x138] sm:$0xf0]  ;;  %v2972_v37 = vld [vmem:[#allocation14 + $0x13c] sm:$0xf0]  ;;  %v3490_v22 = vld [vmem:[#allocation14 + $0x2e4] sm:$0xf] }
 0x127   :  { %2008 = vmatpush.bf16.msra.mxu3 %v3215_v27  ;;  %v2855_v27 = vor.u32 %v3405_v17, %v2852_v4  ;;  %v3427_v17 = vld [vmem:[#allocation14 + $0xec] sm:$0xf]  ;;  %v2944_v4 = vld [vmem:[#allocation14 + $0x104] sm:$0xf0]  ;;  %v3493_v20 = vld [vmem:[#allocation14 + $0x2f8] sm:$0xf0]  ;;  %v3199_v24 = vor.u32 %v3490_v22, %v3196_v23 }
 0x128   :  { %1996 = vmatpush.bf16.msra.mxu1 %v2935_v47  ;;  %v3034_v22 = vld [vmem:[#allocation14 + $0x198] sm:$0xf] }
 0x129   :  { %2036 = vmatpush.bf16.msrb.mxu2 %v3219_v31 }
 0x12a   :  { %2023 = vmatpush.bf16.msrb.mxu0 %v2967_v34  ;;  %v3451_v34 = vld [vmem:[#allocation14 + $0x1a8] sm:$0xf0] }
 0x12b   :  { %2009 = vmatpush.bf16.msra.mxu3 %v3187_v42  ;;  %v2823_v42 = vor.u32 %v3401_v29, %v2822_v28  ;;  %v3027_v53 = vor.u32 %v3451_v34, %v3026_v33  ;;  %v3420_v28 = vld [vmem:[#allocation14 + $0xb4] sm:$0xf]  ;;  %v2916_v29 = vld [vmem:[#allocation14 + $0xcc] sm:$0xf0]  ;;  %v3483_v34 = vld [vmem:[#allocation14 + $0x2ac] sm:$0xf] }
 0x12c   :  { %1997 = vmatpush.bf16.msra.mxu1 %v2907_v62 }
 0x12d   :  { %2037 = vmatpush.bf16.msrb.mxu2 %v3191_v43  ;;  %v3457_v43 = vld [vmem:[#allocation14 + $0x1d8] sm:$0xf0] }
 0x12e   :  { %2024 = vmatpush.bf16.msrb.mxu0 %v2939_v52  ;;  %v2827_v52 = vor.u32 %v3398_v30, %v2824_v32  ;;  %v3047_v62 = vor.u32 %v3457_v43, %v3046_v41  ;;  %v2919_v30 = vor.u32 %v3420_v28, %v2916_v29  ;;  %v3486_v32 = vld [vmem:[#allocation14 + $0x2c0] sm:$0xf0]  ;;  %v3413_v41 = vld [vmem:[#allocation14 + $0x7c] sm:$0xf] }
 0x12f   :  { %2010 = vmatpush.bf16.msra.mxu3 %v3159_v58  ;;  %v3031_v58 = vor.u32 %v3448_v38, %v3028_v39  ;;  %v2886_v38 = vld [vmem:[#allocation14 + $0x78] sm:$0xf]  ;;  %v3416_v39 = vld [vmem:[#allocation14 + $0x90] sm:$0xf0] }
 0x130   :  { %1998 = vmatpush.bf16.msra.mxu1 %v2879_v54  ;;  %v3434_v54 = vld [vmem:[#allocation14 + $0x124] sm:$0xf] }
 0x131   :  { %2038 = vmatpush.bf16.msrb.mxu2 %v3163_v59  ;;  %v2998_v59 = vld [vmem:[#allocation14 + $0x158] sm:$0xf]  ;;  %v2975_v15 = vor.u32 %v3434_v54, %v2972_v37  ;;  %v3084_v54 = vld [vmem:[#allocation14 + $0x21c] sm:$0xf0] }
 0x132   :  { %2025 = vmatpush.bf16.msrb.mxu0 %v2911_v3  ;;  %v3251_v3 = vor.u32 %v3507_v51, %v3250_v50  ;;  %v2999_v8 = vor.u32 %v3444_v61, %v2998_v59  ;;  %v3140_v50 = vld [vmem:[#allocation14 + $0x28c] sm:$0xf0]  ;;  %v3110_v59 = vld [vmem:[#allocation14 + $0x238] sm:$0xf]  ;;  %v3472_v61 = vld [vmem:[#allocation14 + $0x250] sm:$0xf0] }
 0x133   :  { %2011 = vmatpush.bf16.msra.mxu3 %v3131_v11  ;;  %v3003_v11 = vor.u32 %v3441_v0, %v3000_v1  ;;  %v3469_v0 = vld [vmem:[#allocation14 + $0x23c] sm:$0xf]  ;;  %v3112_v1 = vld [vmem:[#allocation14 + $0x254] sm:$0xf0] }
 0x134   :  { %1999 = vmatpush.bf16.msra.mxu1 %v2851_v21 }
 0x135   :  { %2039 = vmatpush.bf16.msrb.mxu2 %v3135_v12  ;;  %v2970_v12 = vld [vmem:[#allocation14 + $0x120] sm:$0xf] }
 0x136   :  { %2026 = vmatpush.bf16.msrb.mxu0 %v2883_v44  ;;  %v2971_v44 = vor.u32 %v3437_v13, %v2970_v12  ;;  %v3462_v13 = vld [vmem:[#allocation14 + $0x204] sm:$0xf] }
 0x137   :  { %2012 = vmatpush.bf16.msra.mxu3 %v3103_v60  ;;  %v2947_v60 = vor.u32 %v3427_v17, %v2944_v4  ;;  %v3087_v37 = vor.u32 %v3462_v13, %v3084_v54  ;;  %v1153_v17 = vld [vmem:[#allocation13] sm:$0x3] }
 0x138   :  { %2000 = vmatpush.bf16.msra.mxu1 %v2823_v42  ;;  %v2888_v42 = vld [vmem:[#allocation14 + $0x94] sm:$0xf0] }
 0x139   :  { %2040 = vmatpush.bf16.msrb.mxu2 %v3107_v19  ;;  %v3194_v19 = vld [vmem:[#allocation14 + $0x2e0] sm:$0xf]  ;;  %v2891_v43 = vor.u32 %v3413_v41, %v2888_v42  ;;  %v3508_v41 = vld [vmem:[#allocation14 + $0x370] sm:$0xf0]  ;;  %v3505_v42 = vld [vmem:[#allocation14 + $0x35c] sm:$0xf] }
 0x13a   :  { %2027 = vmatpush.bf16.msrb.mxu0 %v2855_v27  ;;  %v3195_v21 = vor.u32 %v3493_v20, %v3194_v19  ;;  %v1156_v20 = vperm.slane %v1153_v17, 1 }
 0x13b   :  { %2013 = vmatpush.bf16.msra.mxu3 %v3075_v36 }
 0x13c   :  { %2049 = vmatpush.bf16.msrb.mxu1 %v3027_v53  ;;  %v3409_v53 = vld [vmem:[#allocation14 + $0x58] sm:$0xf0] }
 0x13d   :  { %2041 = vmatpush.bf16.msrb.mxu2 %v3079_v40  ;;  %v2887_v40 = vor.u32 %v3416_v39, %v2886_v38  ;;  %v3258_v39 = vld [vmem:[#allocation14 + $0x358] sm:$0xf] }
 0x13e   :  { %2028 = vmatpush.bf16.msrb.mxu0 %v2827_v52  ;;  %v2858_v52 = vld [vmem:[#allocation14 + $0x40] sm:$0xf] }
 0x13f   :  { %2014 = vmatpush.bf16.msra.mxu3 %v3047_v62  ;;  %v2859_v55 = vor.u32 %v3409_v53, %v2858_v52  ;;  %v3111_v62 = vor.u32 %v3472_v61, %v3110_v59  ;;  %v3435_v52 = vld [vmem:[#allocation14 + $0x12c] sm:$0xf]  ;;  %v2980_v53 = vld [vmem:[#allocation14 + $0x144] sm:$0xf0]  ;;  %v3501_v59 = vld [vmem:[#allocation14 + $0x338] sm:$0xf0] }
 0x140   :  { %2050 = vmatpush.bf16.msrb.mxu1 %v2999_v8  ;;  %v2832_v8 = vld [vmem:[#allocation14 + $0x24] sm:$0xf0]  ;;  %v3498_v61 = vld [vmem:[#allocation14 + $0x324] sm:$0xf] }
 0x143   :  { %2063 = vmatpush.bf16.msrb.mxu3 %v3251_v3  ;;  %v2830_v3 = vld [vmem:[#allocation14 + $0x8] sm:$0xf] }
 0x144   :  { %2051 = vmatpush.bf16.msrb.mxu1 %v2971_v44 }
 0x176   :  { %v1115_v46 = vpop.f32.mrf.mxu1 }
 0x177   :  { %v1116_v18 = vadd.f32 %v3527_v10, %v1115_v46  ;;  %v3048_v46 = vld [vmem:[#allocation14 + $0x1dc] sm:$0xf0] }
 0x178   :  { %v3051_v2 = vor.u32 %v3454_v45, %v3048_v46  ;;  %v3138_v45 = vld [vmem:[#allocation14 + $0x270] sm:$0xf]  ;;  %v3479_v46 = vld [vmem:[#allocation14 + $0x288] sm:$0xf0] }
 0x17a   :  { %2042 = vmatpush.bf16.msrb.mxu2 %v3051_v2  ;;  %v3115_v2 = vor.u32 %v3469_v0, %v3112_v1  ;;  %v2983_v1 = vor.u32 %v3435_v52, %v2980_v53 }
 0x17e   :  { %v1117_v48 = vpop.f32.mrf.mxu1 }
 0x17f   :  { %v1118_v25 = vadd.f32 %v3527_v10, %v1117_v48  ;;  %v3224_v10 = vld [vmem:[#allocation14 + $0x334] sm:$0xf0]  ;;  %v3430_v48 = vld [vmem:[#allocation14 + $0x100] sm:$0xf0] }
 0x180   :  { %v3227_v14 = vor.u32 %v3497_v9, %v3224_v10  ;;  %v3082_v10 = vld [vmem:[#allocation14 + $0x200] sm:$0xf] }
 0x1a7   :  { %v1129_v7 = vpop.f32.mrf.mxu3 }
 0x1a8   :  { %v1130_v26 = vadd.f32 %v1129_v7, %v1116_v18  ;;  %v3500_v7 = vld [vmem:[#allocation14 + $0x330] sm:$0xf0]  ;;  %v2943_v18 = vor.u32 %v3430_v48, %v2942_v16  ;;  %v3056_v16 = vld [vmem:[#allocation14 + $0x1e4] sm:$0xf0] }
 0x1a9   :  { %v3223_v63 = vor.u32 %v3500_v7, %v3222_v6  ;;  %v3399_v7 = vld [vmem:[#allocation14 + $0xc] sm:$0xf] }
 0x1aa   :  { %v1134_v47 = vmax.f32 %v1130_v26, 0.0  ;;  %2052 = vmatpush.bf16.msrb.mxu1 %v2943_v18  ;;  %v3423_v26 = vld [vmem:[#allocation14 + $0xc8] sm:$0xf0]  ;;  %v2835_v9 = vor.u32 %v3399_v7, %v2832_v8  ;;  %v1155_v18 = vperm.slane %v1153_v17, 0 }
 0x1ab   :  { %2064 = vmatpush.bf16.msrb.mxu3 %v3223_v63  ;;  %v3054_v63 = vld [vmem:[#allocation14 + $0x1c8] sm:$0xf]  ;;  %v3487_v17 = vld [vmem:[#allocation14 + $0x2c8] sm:$0xf0] }
 0x1af   :  { %v1131_v31 = vpop.f32.mrf.mxu3  ;;  %2065 = vmatpush.bf16.msrb.mxu3 %v3195_v21 }
 0x1b0   :  { %v1132_v35 = vadd.f32 %v1131_v31, %v1118_v25  ;;  %v2914_v25 = vld [vmem:[#allocation14 + $0xb0] sm:$0xf]  ;;  %v3166_v31 = vld [vmem:[#allocation14 + $0x2a8] sm:$0xf] }
 0x1b1   :  { %v2915_v27 = vor.u32 %v3423_v26, %v2914_v25  ;;  %v3167_v33 = vor.u32 %v3486_v32, %v3166_v31  ;;  %v3449_v25 = vld [vmem:[#allocation14 + $0x19c] sm:$0xf]  ;;  %v3036_v26 = vld [vmem:[#allocation14 + $0x1b4] sm:$0xf0]  ;;  %v3006_v31 = vld [vmem:[#allocation14 + $0x160] sm:$0xf] }
 0x1b2   :  { %v1135_v49 = vmax.f32 %v1132_v35, 0.0  ;;  %v3168_v35 = vld [vmem:[#allocation14 + $0x2c4] sm:$0xf0] }
 0x1b3   :  { %2053 = vmatpush.bf16.msrb.mxu1 %v2915_v27  ;;  %v3171_v36 = vor.u32 %v3483_v34, %v3168_v35  ;;  %2066 = vmatpush.bf16.msrb.mxu3 %v3167_v33  ;;  %v3445_v34 = vld [vmem:[#allocation14 + $0x178] sm:$0xf0]  ;;  %v3442_v35 = vld [vmem:[#allocation14 + $0x164] sm:$0xf] }
 0x1b4   :  { %v1136_v57 = vpack.c.bf16 %v1135_v49, %v1134_v47  ;;  %v3139_v47 = vor.u32 %v3479_v46, %v3138_v45  ;;  %v3476_v49 = vld [vmem:[#allocation14 + $0x274] sm:$0xf]  ;;  %v3007_v45 = vor.u32 %v3445_v34, %v3006_v31  ;;  %v3410_v34 = vld [vmem:[#allocation14 + $0x60] sm:$0xf0] }
 0x1b5   :  { %v3143_v51 = vor.u32 %v3476_v49, %v3140_v50  ;;  %v3438_v49 = vld [vmem:[#allocation14 + $0x140] sm:$0xf0] }
 0x1b6   :  { %1247 = vmatmul.bf16.vlgmr.msra.gmra.mxu0 %v1136_v57  ;;  %1261 = vmatmul.bf16.vlgmr.msra.gmra.mxu2 %v1136_v57  ;;  %v2860_v57 = vld [vmem:[#allocation14 + $0x5c] sm:$0xf0] }
 0x1b7   :  { %2077 = vmatpush.bf16.msra.mxu0 %v3031_v58  ;;  %2091 = vmatpush.bf16.msra.mxu2 %v3255_v5  ;;  %v2863_v58 = vor.u32 %v3406_v56, %v2860_v57  ;;  %v3402_v5 = vld [vmem:[#allocation14 + $0x20] sm:$0xf0]  ;;  %v3230_v57 = vld [vmem:[#allocation14 + $0x320] sm:$0xf] }
 0x1b8   :  { %2054 = vmatpush.bf16.msrb.mxu1 %v2887_v40  ;;  %2067 = vmatpush.bf16.msrb.mxu3 %v3139_v47  ;;  %v2831_v6 = vor.u32 %v3402_v5, %v2830_v3  ;;  %v2978_v47 = vld [vmem:[#allocation14 + $0x128] sm:$0xf]  ;;  %v3431_v3 = vld [vmem:[#allocation14 + $0x108] sm:$0xf0]  ;;  %v3428_v5 = vld [vmem:[#allocation14 + $0xf4] sm:$0xf]  ;;  %v3231_v7 = vor.u32 %v3501_v59, %v3230_v57 }
 0x1b9   :  { %v2979_v0 = vor.u32 %v3438_v49, %v2978_v47  ;;  %v2838_v47 = vld [vmem:[#allocation14 + $0x10] sm:$0xf]  ;;  %v3403_v49 = vld [vmem:[#allocation14 + $0x28] sm:$0xf0]  ;;  %v3090_v57 = vld [vmem:[#allocation14 + $0x208] sm:$0xf] }
 0x1ba   :  { %v3466_v59 = vld [vmem:[#allocation14 + $0x220] sm:$0xf0] }
 0x1bb   :  { %2078 = vmatpush.bf16.msra.mxu0 %v3003_v11  ;;  %2092 = vmatpush.bf16.msra.mxu2 %v3227_v14  ;;  %v3465_v11 = vld [vmem:[#allocation14 + $0x218] sm:$0xf0]  ;;  %v3458_v14 = vld [vmem:[#allocation14 + $0x1e0] sm:$0xf0] }
 0x1bc   :  { %2055 = vmatpush.bf16.msrb.mxu1 %v2859_v55  ;;  %2068 = vmatpush.bf16.msrb.mxu3 %v3111_v62  ;;  %v3083_v12 = vor.u32 %v3465_v11, %v3082_v10  ;;  %v3055_v44 = vor.u32 %v3458_v14, %v3054_v63  ;;  %v3259_v55 = vor.u32 %v3508_v41, %v3258_v39  ;;  %v3232_v62 = vld [vmem:[#allocation14 + $0x33c] sm:$0xf0]  ;;  %v3494_v10 = vld [vmem:[#allocation14 + $0x300] sm:$0xf0]  ;;  %v3491_v11 = vld [vmem:[#allocation14 + $0x2ec] sm:$0xf] }
 0x1bd   :  { %v3235_v8 = vor.u32 %v3498_v61, %v3232_v62  ;;  %v3424_v63 = vld [vmem:[#allocation14 + $0xd0] sm:$0xf0]  ;;  %v3421_v14 = vld [vmem:[#allocation14 + $0xbc] sm:$0xf]  ;;  %v3463_v61 = vld [vmem:[#allocation14 + $0x20c] sm:$0xf] }
 0x1be   :  { %v3473_v41 = vld [vmem:[#allocation14 + $0x258] sm:$0xf0]  ;;  %v3092_v62 = vld [vmem:[#allocation14 + $0x224] sm:$0xf0] }
 0x1bf   :  { %2079 = vmatpush.bf16.msra.mxu0 %v2975_v15  ;;  %2093 = vmatpush.bf16.msra.mxu2 %v3199_v24  ;;  %v3455_v15 = vld [vmem:[#allocation14 + $0x1cc] sm:$0xf]  ;;  %v3452_v24 = vld [vmem:[#allocation14 + $0x1b0] sm:$0xf0] }
 0x1c0   :  { %2056 = vmatpush.bf16.msrb.mxu1 %v2831_v6  ;;  %2069 = vmatpush.bf16.msrb.mxu3 %v3083_v12  ;;  %v3059_v48 = vor.u32 %v3455_v15, %v3056_v16  ;;  %v3035_v29 = vor.u32 %v3452_v24, %v3034_v22  ;;  %v2952_v6 = vld [vmem:[#allocation14 + $0x10c] sm:$0xf0]  ;;  %v3204_v12 = vld [vmem:[#allocation14 + $0x304] sm:$0xf0]  ;;  %v3414_v22 = vld [vmem:[#allocation14 + $0x84] sm:$0xf] }
 0x1c1   :  { %v2955_v54 = vor.u32 %v3428_v5, %v2952_v6  ;;  %v3207_v16 = vor.u32 %v3491_v11, %v3204_v12  ;;  %v3095_v5 = vor.u32 %v3463_v61, %v3092_v62  ;;  %v3014_v6 = vld [vmem:[#allocation14 + $0x168] sm:$0xf]  ;;  %v3064_v11 = vld [vmem:[#allocation14 + $0x1ec] sm:$0xf0]  ;;  %v3266_v12 = vld [vmem:[#allocation14 + $0x360] sm:$0xf] }
 0x1c3   :  { %2080 = vmatpush.bf16.msra.mxu0 %v2947_v60  ;;  %2094 = vmatpush.bf16.msra.mxu2 %v3171_v36  ;;  %v3008_v36 = vld [vmem:[#allocation14 + $0x17c] sm:$0xf0] }
 0x1c4   :  { %2070 = vmatpush.bf16.msrb.mxu3 %v3055_v44  ;;  %v3011_v46 = vor.u32 %v3442_v35, %v3008_v36  ;;  %v2924_v44 = vld [vmem:[#allocation14 + $0xd4] sm:$0xf0]  ;;  %v3407_v35 = vld [vmem:[#allocation14 + $0x4c] sm:$0xf]  ;;  %v2868_v36 = vld [vmem:[#allocation14 + $0x64] sm:$0xf0] }
 0x1c7   :  { %2081 = vmatpush.bf16.msra.mxu0 %v2919_v30  ;;  %2095 = vmatpush.bf16.msra.mxu2 %v3143_v51  ;;  %v3039_v30 = vor.u32 %v3449_v25, %v3036_v26  ;;  %v3146_v26 = vld [vmem:[#allocation14 + $0x278] sm:$0xf] }
 0x1cb   :  { %2082 = vmatpush.bf16.msra.mxu0 %v2891_v43  ;;  %2096 = vmatpush.bf16.msra.mxu2 %v3115_v2  ;;  %v3260_v43 = vld [vmem:[#allocation14 + $0x374] sm:$0xf0]  ;;  %v2950_v2 = vld [vmem:[#allocation14 + $0xf0] sm:$0xf] }
 0x1cc   :  { %v3263_v56 = vor.u32 %v3505_v42, %v3260_v43  ;;  %v2951_v13 = vor.u32 %v3431_v3, %v2950_v2  ;;  %v3470_v42 = vld [vmem:[#allocation14 + $0x244] sm:$0xf]  ;;  %v3120_v43 = vld [vmem:[#allocation14 + $0x25c] sm:$0xf0]  ;;  %v3091_v3 = vor.u32 %v3466_v59, %v3090_v57 }
 0x1cd   :  { %v3123_v53 = vor.u32 %v3470_v42, %v3120_v43  ;;  %v2846_v42 = vld [vmem:[#allocation14 + $0x18] sm:$0xf]  ;;  %v3404_v43 = vld [vmem:[#allocation14 + $0x30] sm:$0xf0] }
 0x1ce   :  { %v3957_v57 = vld [vmem:[%s3980_s8] sm:$0xff]  ;;  %s3828_s8 = smov [#allocation16]  }
 0x1cf   :  { %2083 = vmatpush.bf16.msra.mxu0 %v2863_v58  ;;  %2097 = vmatpush.bf16.msra.mxu2 %v3087_v37  ;;  %v2922_v37 = vld [vmem:[#allocation14 + $0xb8] sm:$0xf]  ;;  %v1403_v59 = vperm.slane %v3957_v57, 0  ;;  %v1404_v61 = vperm.slane %v3957_v57, 1  ;;  %s2279_s28 = sshll.u32 %s3828_s8, 4  ;;  %s2280_s28 = int_to_ptr.vmem [resolvable:$true] %s2279_s28 }
 0x1d3   :  { %2084 = vmatpush.bf16.msra.mxu0 %v2835_v9  ;;  %2098 = vmatpush.bf16.msra.mxu2 %v3059_v48  ;;  %v3202_v9 = vld [vmem:[#allocation14 + $0x2e8] sm:$0xf]  ;;  %v3174_v48 = vld [vmem:[#allocation14 + $0x2b0] sm:$0xf] }
 0x1d4   :  { %v3203_v15 = vor.u32 %v3494_v10, %v3202_v9  ;;  %v3175_v24 = vor.u32 %v3487_v17, %v3174_v48  ;;  %v3459_v9 = vld [vmem:[#allocation14 + $0x1e8] sm:$0xf0]  ;;  %v3456_v10 = vld [vmem:[#allocation14 + $0x1d4] sm:$0xf]  ;;  %v3502_v48 = vld [vmem:[#allocation14 + $0x340] sm:$0xf0] }
 0x233   :  { %v1248_v4 = vpop.f32.mrf.mxu0 }
 0x234   :  { %v1249_v19 = vadd.f32 %v1248_v4, %v1155_v18  ;;  %v3484_v4 = vld [vmem:[#allocation14 + $0x2b4] sm:$0xf] }
 0x236   :  { %v1267_v27 = vmax.f32 %v1249_v19, 0.0  ;;  %v2927_v19 = vor.u32 %v3421_v14, %v2924_v44  ;;  %v2986_v14 = vld [vmem:[#allocation14 + $0x130] sm:$0xf]  ;;  %v3439_v44 = vld [vmem:[#allocation14 + $0x148] sm:$0xf0] }
 0x237   :  { %v2987_v17 = vor.u32 %v3439_v44, %v2986_v14  ;;  %v1405_v44 = vperm.slane %v3957_v57, 2 }
 0x239   :  { %v1262_v60 = vpop.f32.mrf.mxu2 }
 0x23a   :  { %v1263_v32 = vadd.f32 %v1262_v60, %v1156_v20  ;;  %v2923_v60 = vor.u32 %v3424_v63, %v2922_v37  ;;  %v3067_v63 = vor.u32 %v3456_v10, %v3064_v11 }
 0x23b   :  { %v1250_v21 = vpop.f32.mrf.mxu0 }
 0x23c   :  { %v1251_v23 = vadd.f32 %v1250_v21, %v1155_v18  ;;  %v1268_v50 = vmax.f32 %v1263_v32, 0.0  ;;  %v3176_v18 = vld [vmem:[#allocation14 + $0x2cc] sm:$0xf0]  ;;  %v3417_v21 = vld [vmem:[#allocation14 + $0x98] sm:$0xf0] }
 0x23d   :  { %v3179_v25 = vor.u32 %v3484_v4, %v3176_v18  ;;  %v2866_v32 = vld [vmem:[#allocation14 + $0x48] sm:$0xf]  ;;  %v2958_v4 = vld [vmem:[#allocation14 + $0xf8] sm:$0xf]  ;;  %v3432_v18 = vld [vmem:[#allocation14 + $0x110] sm:$0xf0] }
 0x23e   :  { %v1269_v28 = vmax.f32 %v1251_v23, 0.0  ;;  %v2896_v23 = vld [vmem:[#allocation14 + $0x9c] sm:$0xf0] }
 0x23f   :  { %v2899_v31 = vor.u32 %v3414_v22, %v2896_v23  ;;  %v2930_v22 = vld [vmem:[#allocation14 + $0xc0] sm:$0xf]  ;;  %v3425_v23 = vld [vmem:[#allocation14 + $0xd8] sm:$0xf0] }
 0x240   :  { %v3936_v33 = vpack.c.bf16 %v1269_v28, %v1267_v27  ;;  %v3480_v27 = vld [vmem:[#allocation14 + $0x290] sm:$0xf0]  ;;  %v3477_v28 = vld [vmem:[#allocation14 + $0x27c] sm:$0xf] }
 0x241   :  { %v1264_v38 = vpop.f32.mrf.mxu2 }
 0x242   :  { %v1265_v40 = vadd.f32 %v1264_v38, %v1156_v20  ;;  %2001 = vmatmul.bf16.vlgmr.msra.gmra.mxu1 %v3936_v33  ;;  %2029 = vmatmul.bf16.vlgmr.msrb.gmra.mxu0 %v3936_v33  ;;  %v2894_v20 = vld [vmem:[#allocation14 + $0x80] sm:$0xf]  ;;  %v3147_v38 = vor.u32 %v3480_v27, %v3146_v26  ;;  %v3488_v26 = vld [vmem:[#allocation14 + $0x2d0] sm:$0xf0]  ;;  %v2931_v27 = vor.u32 %v3425_v23, %v2930_v22 }
 0x243   :  { %2105 = vmatpush.bf16.msra.mxu1 %v3035_v29  ;;  %2133 = vmatpush.bf16.msrb.mxu0 %v3039_v30  ;;  %v3148_v29 = vld [vmem:[#allocation14 + $0x294] sm:$0xf0]  ;;  %v2895_v30 = vor.u32 %v3417_v21, %v2894_v20  ;;  %v3495_v20 = vld [vmem:[#allocation14 + $0x308] sm:$0xf0]  ;;  %v2959_v21 = vor.u32 %v3432_v18, %v2958_v4 }
 0x244   :  { %v1270_v51 = vmax.f32 %v1265_v40, 0.0  ;;  %v3151_v39 = vor.u32 %v3477_v28, %v3148_v29  ;;  %v3118_v40 = vld [vmem:[#allocation14 + $0x240] sm:$0xf]  ;;  %v2902_v28 = vld [vmem:[#allocation14 + $0x88] sm:$0xf] }
 0x245   :  { %v3119_v52 = vor.u32 %v3473_v41, %v3118_v40  ;;  %v3418_v29 = vld [vmem:[#allocation14 + $0xa0] sm:$0xf0] }
 0x246   :  { %v3940_v58 = vpack.c.bf16 %v1270_v51, %v1268_v50  ;;  %v3400_v50 = vld [vmem:[#allocation14 + $0x14] sm:$0xf]  ;;  %v2840_v51 = vld [vmem:[#allocation14 + $0x2c] sm:$0xf0]  ;;  %v3474_v40 = vld [vmem:[#allocation14 + $0x260] sm:$0xf0] }
 0x247   :  { %2106 = vmatpush.bf16.msra.mxu1 %v3007_v45  ;;  %2134 = vmatpush.bf16.msrb.mxu0 %v3011_v46  ;;  %v2867_v45 = vor.u32 %v3410_v34, %v2866_v32  ;;  %v2871_v46 = vor.u32 %v3407_v35, %v2868_v36  ;;  %v3481_v32 = vld [vmem:[#allocation14 + $0x298] sm:$0xf0]  ;;  %v2903_v34 = vor.u32 %v3418_v29, %v2902_v28  ;;  %v2874_v35 = vld [vmem:[#allocation14 + $0x50] sm:$0xf]  ;;  %v3411_v36 = vld [vmem:[#allocation14 + $0x68] sm:$0xf0] }
 0x248   :  { %2015 = vmatmul.bf16.vlgmr.msra.gmra.mxu3 %v3940_v58  ;;  %2043 = vmatmul.bf16.vlgmr.msrb.gmra.mxu2 %v3940_v58  ;;  %v2875_v41 = vor.u32 %v3411_v36, %v2874_v35 }
 0x249   :  { %2119 = vmatpush.bf16.msra.mxu3 %v3259_v55  ;;  %2147 = vmatpush.bf16.msrb.mxu2 %v3263_v56  ;;  %v3042_v55 = vld [vmem:[#allocation14 + $0x1a0] sm:$0xf]  ;;  %v3453_v56 = vld [vmem:[#allocation14 + $0x1b8] sm:$0xf0] }
 0x24a   :  { %v3043_v2 = vor.u32 %v3453_v56, %v3042_v55 }
 0x24b   :  { %2107 = vmatpush.bf16.msra.mxu1 %v2979_v0  ;;  %2135 = vmatpush.bf16.msrb.mxu0 %v2983_v1  ;;  %v2839_v0 = vor.u32 %v3403_v49, %v2838_v47  ;;  %v2843_v1 = vor.u32 %v3400_v50, %v2840_v51  ;;  %v3467_v47 = vld [vmem:[#allocation14 + $0x228] sm:$0xf0]  ;;  %v2847_v49 = vor.u32 %v3404_v43, %v2846_v42  ;;  %v3070_v51 = vld [vmem:[#allocation14 + $0x1d8] sm:$0xf] }
 0x24d   :  { %2120 = vmatpush.bf16.msra.mxu3 %v3231_v7  ;;  %2148 = vmatpush.bf16.msrb.mxu2 %v3235_v8  ;;  %v3446_v7 = vld [vmem:[#allocation14 + $0x180] sm:$0xf0]  ;;  %v3062_v8 = vld [vmem:[#allocation14 + $0x1d0] sm:$0xf] }
 0x24e   :  { %v3063_v37 = vor.u32 %v3459_v9, %v3062_v8 }
 0x24f   :  { %2108 = vmatpush.bf16.msra.mxu1 %v2951_v13  ;;  %2136 = vmatpush.bf16.msrb.mxu0 %v2955_v54  ;;  %v3509_v13 = vld [vmem:[#allocation14 + $0x378] sm:$0xf0]  ;;  %v3015_v54 = vor.u32 %v3446_v7, %v3014_v6 }
 0x251   :  { %2121 = vmatpush.bf16.msra.mxu3 %v3203_v15  ;;  %2149 = vmatpush.bf16.msrb.mxu2 %v3207_v16  ;;  %v3267_v15 = vor.u32 %v3509_v13, %v3266_v12  ;;  %v3238_v16 = vld [vmem:[#allocation14 + $0x328] sm:$0xf] }
 0x252   :  { %2057 = vmatmul.bf16.vlgmr.msrb.gmra.mxu1 %v3936_v33  ;;  %2085 = vmatmul.bf16.vlgmr.msra.gmra.mxu0 %v3936_v33 }
 0x253   :  { %2109 = vmatpush.bf16.msra.mxu1 %v2923_v60  ;;  %2137 = vmatpush.bf16.msrb.mxu0 %v2927_v19  ;;  %v3239_v60 = vor.u32 %v3502_v48, %v3238_v16  ;;  %v3210_v19 = vld [vmem:[#allocation14 + $0x2f0] sm:$0xf] }
 0x255   :  { %2122 = vmatpush.bf16.msra.mxu3 %v3175_v24  ;;  %2150 = vmatpush.bf16.msrb.mxu2 %v3179_v25  ;;  %v3211_v24 = vor.u32 %v3495_v20, %v3210_v19  ;;  %v3182_v25 = vld [vmem:[#allocation14 + $0x2b8] sm:$0xf] }
 0x257   :  { %2110 = vmatpush.bf16.msra.mxu1 %v2895_v30  ;;  %2138 = vmatpush.bf16.msrb.mxu0 %v2899_v31  ;;  %v3183_v30 = vor.u32 %v3488_v26, %v3182_v25  ;;  %v3154_v31 = vld [vmem:[#allocation14 + $0x280] sm:$0xf] }
 0x258   :  { %2071 = vmatmul.bf16.vlgmr.msrb.gmra.mxu3 %v3940_v58  ;;  %2099 = vmatmul.bf16.vlgmr.msra.gmra.mxu2 %v3940_v58 }
 0x259   :  { %2123 = vmatpush.bf16.msra.mxu3 %v3147_v38  ;;  %2151 = vmatpush.bf16.msrb.mxu2 %v3151_v39  ;;  %v3155_v38 = vor.u32 %v3481_v32, %v3154_v31  ;;  %v3126_v39 = vld [vmem:[#allocation14 + $0x248] sm:$0xf] }
 0x25b   :  { %2111 = vmatpush.bf16.msra.mxu1 %v2867_v45  ;;  %2139 = vmatpush.bf16.msrb.mxu0 %v2871_v46  ;;  %v3127_v45 = vor.u32 %v3474_v40, %v3126_v39  ;;  %v3098_v46 = vld [vmem:[#allocation14 + $0x210] sm:$0xf] }
 0x25c   :  { %v3099_v50 = vor.u32 %v3467_v47, %v3098_v46 }
 0x25d   :  { %2124 = vmatpush.bf16.msra.mxu3 %v3119_v52  ;;  %2152 = vmatpush.bf16.msrb.mxu2 %v3123_v53  ;;  %v3460_v52 = vld [vmem:[#allocation14 + $0x1f0] sm:$0xf0] }
 0x25e   :  { %v3071_v53 = vor.u32 %v3460_v52, %v3070_v51  ;;  %v1407_v51 = vperm.slane %v3957_v57, 4 }
 0x25f   :  { %2112 = vmatpush.bf16.msra.mxu1 %v2839_v0  ;;  %2140 = vmatpush.bf16.msrb.mxu0 %v2843_v1 }
 0x261   :  { %2125 = vmatpush.bf16.msra.mxu3 %v3091_v3  ;;  %2153 = vmatpush.bf16.msrb.mxu2 %v3095_v5 }
 0x262   :  { %2113 = vmatmul.bf16.vlgmr.msra.gmra.mxu1 %v3936_v33  ;;  %2141 = vmatmul.bf16.vlgmr.msrb.gmra.mxu0 %v3936_v33 }
 0x263   :  { %2161 = vmatpush.bf16.msrb.mxu1 %v3043_v2 }
 0x265   :  { %2126 = vmatpush.bf16.msra.mxu3 %v3063_v37  ;;  %2154 = vmatpush.bf16.msrb.mxu2 %v3067_v63 }
 0x267   :  { %2162 = vmatpush.bf16.msrb.mxu1 %v3015_v54 }
 0x268   :  { %2127 = vmatmul.bf16.vlgmr.msra.gmra.mxu3 %v3940_v58  ;;  %2155 = vmatmul.bf16.vlgmr.msrb.gmra.mxu2 %v3940_v58 }
 0x269   :  { %2175 = vmatpush.bf16.msrb.mxu3 %v3267_v15  ;;  %v1406_v15 = vperm.slane %v3957_v57, 3 }
 0x26b   :  { %2163 = vmatpush.bf16.msrb.mxu1 %v2987_v17 }
 0x26d   :  { %2176 = vmatpush.bf16.msrb.mxu3 %v3239_v60 }
 0x26f   :  { %2164 = vmatpush.bf16.msrb.mxu1 %v2959_v21 }
 0x271   :  { %2177 = vmatpush.bf16.msrb.mxu3 %v3211_v24 }
 0x273   :  { %2165 = vmatpush.bf16.msrb.mxu1 %v2931_v27 }
 0x275   :  { %2178 = vmatpush.bf16.msrb.mxu3 %v3183_v30 }
 0x277   :  { %2166 = vmatpush.bf16.msrb.mxu1 %v2903_v34 }
 0x279   :  { %2179 = vmatpush.bf16.msrb.mxu3 %v3155_v38 }
 0x27b   :  { %2167 = vmatpush.bf16.msrb.mxu1 %v2875_v41 }
 0x27d   :  { %2180 = vmatpush.bf16.msrb.mxu3 %v3127_v45 }
 0x27f   :  { %2168 = vmatpush.bf16.msrb.mxu1 %v2847_v49 }
 0x281   :  { %2181 = vmatpush.bf16.msrb.mxu3 %v3099_v50 }
 0x282   :  { %2169 = vmatmul.bf16.vlgmr.msrb.gmra.mxu1 %v3936_v33 }
 0x285   :  { %2182 = vmatpush.bf16.msrb.mxu3 %v3071_v53 }
 0x288   :  { %2183 = vmatmul.bf16.vlgmr.msrb.gmra.mxu3 %v3940_v58 }
 0x2bf   :  { %v2002_v55 = vpop.f32.mrf.mxu1  ;;  %v2030_v56 = vpop.f32.mrf.mxu0 }
 0x2c0   :  { %v2003_v1 = vadd.f32 %v2002_v55, %v1403_v59  ;;  %v2031_v2 = vadd.f32 %v2030_v56, %v1404_v61  ;;  %v1408_v56 = vperm.slane %v3957_v57, 5 }
 0x2c7   :  { %v2004_v62 = vpop.f32.mrf.mxu1  ;;  %v2032_v0 = vpop.f32.mrf.mxu0 }
 0x2c8   :  { %v2005_v11 = vadd.f32 %v2004_v62, %v1403_v59  ;;  %v2033_v12 = vadd.f32 %v2032_v0, %v1404_v61 }
 0x2cb   :  { %v2016_v3 = vpop.f32.mrf.mxu3  ;;  %v2044_v33 = vpop.f32.mrf.mxu2 }
 0x2cc   :  { %v2017_v5 = vadd.f32 %v2016_v3, %v2003_v1  ;;  %v2045_v6 = vadd.f32 %v2044_v33, %v2031_v2 }
 0x2ce   :  { %v2189_v58 = vsub.f32 0.0, %v2017_v5  ;;  %v2190_v7 = vsub.f32 0.0, %v2045_v6 }
 0x2cf   :  { %v2058_v10 = vpop.f32.mrf.mxu1  ;;  %v2086_v13 = vpop.f32.mrf.mxu0 }
 0x2d0   :  { %v2203_v8 = vmul.f32 1.442695, %v2189_v58  ;;  %v2205_v9 = vmul.f32 1.442695, %v2190_v7  ;;  %v2059_v21 = vadd.f32 %v2058_v10, %v1405_v44  ;;  %v2087_v22 = vadd.f32 %v2086_v13, %v1406_v15 }
 0x2d2   :  { %3528 = vpow2.f32 %v2203_v8 }
 0x2d3   :  { %3530 = vpow2.f32 %v2205_v9  ;;  %v2018_v54 = vpop.f32.mrf.mxu3  ;;  %v2046_v37 = vpop.f32.mrf.mxu2 }
 0x2d4   :  { %v2019_v63 = vadd.f32 %v2018_v54, %v2005_v11  ;;  %v2047_v14 = vadd.f32 %v2046_v37, %v2033_v12 }
 0x2d6   :  { %v2196_v16 = vsub.f32 0.0, %v2019_v63  ;;  %v2197_v48 = vsub.f32 0.0, %v2047_v14 }
 0x2d7   :  { %v2060_v23 = vpop.f32.mrf.mxu1  ;;  %v2088_v26 = vpop.f32.mrf.mxu0 }
 0x2d8   :  { %v3529_v17 = vpop.eup %3528  ;;  %v2217_v4 = vmul.f32 1.442695, %v2196_v16  ;;  %v2219_v19 = vmul.f32 1.442695, %v2197_v48  ;;  %v2061_v39 = vadd.f32 %v2060_v23, %v1405_v44  ;;  %v2089_v40 = vadd.f32 %v2088_v26, %v1406_v15 }
 0x2d9   :  { %v3531_v18 = vpop.eup %3530  ;;  %v2231_v60 = vadd.f32 1.0, %v3529_v17 }
 0x2da   :  { %v2232_v20 = vadd.f32 1.0, %v3531_v18  ;;  %3532 = vpow2.f32 %v2217_v4 }
 0x2db   :  { %3534 = vrcp.f32 %v2231_v60  ;;  %v2072_v24 = vpop.f32.mrf.mxu3  ;;  %v2100_v25 = vpop.f32.mrf.mxu2 }
 0x2dc   :  { %3536 = vrcp.f32 %v2232_v20  ;;  %v2073_v27 = vadd.f32 %v2072_v24, %v2059_v21  ;;  %v2101_v28 = vadd.f32 %v2100_v25, %v2087_v22 }
 0x2dd   :  { %3538 = vpow2.f32 %v2219_v19 }
 0x2de   :  { %v2191_v29 = vsub.f32 0.0, %v2073_v27  ;;  %v2192_v30 = vsub.f32 0.0, %v2101_v28 }
 0x2df   :  { %v2114_v50 = vpop.f32.mrf.mxu1  ;;  %v2142_v52 = vpop.f32.mrf.mxu0 }
 0x2e0   :  { %v3533_v31 = vpop.eup %3532  ;;  %v2207_v32 = vmul.f32 1.442695, %v2191_v29  ;;  %v2209_v34 = vmul.f32 1.442695, %v2192_v30  ;;  %v2115_v3 = vadd.f32 %v2114_v50, %v1407_v51  ;;  %v2143_v5 = vadd.f32 %v2142_v52, %v1408_v56 }
 0x2e1   :  { %v3535_v35 = vpop.eup %3534  ;;  %v2238_v36 = vadd.f32 1.0, %v3533_v31 }
 0x2e2   :  { %v3537_v38 = vpop.eup %3536  ;;  %3540 = vpow2.f32 %v2207_v32 }
 0x2e3   :  { %v3539_v41 = vpop.eup %3538  ;;  %v2259_v42 = vpack.c.bf16 %v3537_v38, %v3535_v35  ;;  %3542 = vrcp.f32 %v2238_v36  ;;  %v2074_v43 = vpop.f32.mrf.mxu3 }
 0x2e4   :  { %v2102_v45 = vpop.f32.mrf.mxu2  ;;  %v2239_v46 = vadd.f32 1.0, %v3539_v41  ;;  %3544 = vpow2.f32 %v2209_v34  ;;  %v2075_v47 = vadd.f32 %v2074_v43, %v2061_v39  ;;  %v1409_v43 = vperm.slane %v3957_v57, 6 }
 0x2e5   :  { %v2103_v49 = vadd.f32 %v2102_v45, %v2089_v40  ;;  %2267 = vst [vmem:[#allocation16] sm:$0xff] %v2259_v42 }
 0x2e6   :  { %3546 = vrcp.f32 %v2239_v46  ;;  %v2198_v53 = vsub.f32 0.0, %v2075_v47 }
 0x2e7   :  { %v2199_v55 = vsub.f32 0.0, %v2103_v49  ;;  %v2116_v12 = vpop.f32.mrf.mxu1  ;;  %v2144_v37 = vpop.f32.mrf.mxu0 }
 0x2e8   :  { %v3541_v59 = vpop.eup %3540  ;;  %v2221_v61 = vmul.f32 1.442695, %v2198_v53  ;;  %v2117_v48 = vadd.f32 %v2116_v12, %v1407_v51  ;;  %v2145_v18 = vadd.f32 %v2144_v37, %v1408_v56 }
 0x2e9   :  { %v2223_v62 = vmul.f32 1.442695, %v2199_v55  ;;  %v3543_v0 = vpop.eup %3542  ;;  %v2233_v1 = vadd.f32 1.0, %v3541_v59 }
 0x2ea   :  { %v3545_v2 = vpop.eup %3544  ;;  %3548 = vpow2.f32 %v2221_v61 }
 0x2eb   :  { %3550 = vrcp.f32 %v2233_v1  ;;  %v2234_v33 = vadd.f32 1.0, %v3545_v2  ;;  %v2128_v6 = vpop.f32.mrf.mxu3 }
 0x2ec   :  { %v3547_v58 = vpop.eup %3546  ;;  %3552 = vpow2.f32 %v2223_v62  ;;  %v2129_v7 = vadd.f32 %v2128_v6, %v2115_v3  ;;  %v2156_v8 = vpop.f32.mrf.mxu2 }
 0x2ed   :  { %v2263_v9 = vpack.c.bf16 %v3547_v58, %v3543_v0  ;;  %3554 = vrcp.f32 %v2234_v33  ;;  %v2157_v10 = vadd.f32 %v2156_v8, %v2143_v5 }
 0x2ee   :  { %v2193_v11 = vsub.f32 0.0, %v2129_v7 }
 0x2ef   :  { %2271 = vst [vmem:[#allocation16 + $0x1c] sm:$0xff] %v2263_v9  ;;  %v2194_v13 = vsub.f32 0.0, %v2157_v10 }
 0x2f0   :  { %v3549_v54 = vpop.eup %3548  ;;  %v2211_v63 = vmul.f32 1.442695, %v2193_v11 }
 0x2f1   :  { %v3551_v14 = vpop.eup %3550  ;;  %v2240_v44 = vadd.f32 1.0, %v3549_v54  ;;  %v2213_v15 = vmul.f32 1.442695, %v2194_v13 }
 0x2f2   :  { %v3553_v16 = vpop.eup %3552  ;;  %3556 = vpow2.f32 %v2211_v63 }
 0x2f3   :  { %v3555_v17 = vpop.eup %3554  ;;  %3558 = vrcp.f32 %v2240_v44  ;;  %v2241_v4 = vadd.f32 1.0, %v3553_v16  ;;  %v2130_v60 = vpop.f32.mrf.mxu3 }
 0x2f4   :  { %v2260_v19 = vpack.c.bf16 %v3555_v17, %v3551_v14  ;;  %3560 = vpow2.f32 %v2213_v15  ;;  %v2131_v20 = vadd.f32 %v2130_v60, %v2117_v48  ;;  %v2158_v21 = vpop.f32.mrf.mxu2 }
 0x2f5   :  { %3562 = vrcp.f32 %v2241_v4  ;;  %v2159_v22 = vadd.f32 %v2158_v21, %v2145_v18 }
 0x2f6   :  { %2268 = vst [vmem:[#allocation16 + $0x8] sm:$0xff] %v2260_v19  ;;  %v2200_v23 = vsub.f32 0.0, %v2131_v20 }
 0x2f7   :  { %v2201_v24 = vsub.f32 0.0, %v2159_v22 }
 0x2f8   :  { %v3557_v25 = vpop.eup %3556  ;;  %v2225_v26 = vmul.f32 1.442695, %v2200_v23 }
 0x2f9   :  { %v3559_v27 = vpop.eup %3558  ;;  %v2235_v28 = vadd.f32 1.0, %v3557_v25  ;;  %v2227_v29 = vmul.f32 1.442695, %v2201_v24 }
 0x2fa   :  { %v3561_v30 = vpop.eup %3560  ;;  %3564 = vpow2.f32 %v2225_v26 }
 0x2fb   :  { %v3563_v31 = vpop.eup %3562  ;;  %3566 = vrcp.f32 %v2235_v28  ;;  %v2236_v32 = vadd.f32 1.0, %v3561_v30 }
 0x2fc   :  { %v2264_v34 = vpack.c.bf16 %v3563_v31, %v3559_v27  ;;  %3568 = vpow2.f32 %v2227_v29 }
 0x2fd   :  { %3570 = vrcp.f32 %v2236_v32 }
 0x2fe   :  { %2272 = vst [vmem:[#allocation16 + $0x24] sm:$0xff] %v2264_v34 }
 0x2ff   :  { %v2170_v40 = vpop.f32.mrf.mxu1 }
 0x300   :  { %v3565_v35 = vpop.eup %3564  ;;  %v2171_v46 = vadd.f32 %v2170_v40, %v1409_v43 }
 0x301   :  { %v3567_v36 = vpop.eup %3566  ;;  %v2242_v38 = vadd.f32 1.0, %v3565_v35 }
 0x302   :  { %v3569_v39 = vpop.eup %3568 }
 0x303   :  { %v3571_v41 = vpop.eup %3570  ;;  %3572 = vrcp.f32 %v2242_v38  ;;  %v2243_v42 = vadd.f32 1.0, %v3569_v39 }
 0x304   :  { %v2261_v45 = vpack.c.bf16 %v3571_v41, %v3567_v36 }
 0x305   :  { %3574 = vrcp.f32 %v2243_v42 }
 0x306   :  { %2269 = vst [vmem:[#allocation16 + $0x10] sm:$0xff] %v2261_v45 }
 0x307   :  { %v2172_v55 = vpop.f32.mrf.mxu1 }
 0x308   :  { %v2173_v59 = vadd.f32 %v2172_v55, %v1409_v43 }
 0x309   :  { %v3573_v49 = vpop.eup %3572 }
 0x30b   :  { %v2184_v47 = vpop.f32.mrf.mxu3  ;;  %v3575_v51 = vpop.eup %3574 }
 0x30c   :  { %v2185_v50 = vadd.f32 %v2184_v47, %v2171_v46  ;;  %v2265_v53 = vpack.c.bf16 %v3575_v51, %v3573_v49 }
 0x30e   :  { %v2195_v52 = vsub.f32 0.0, %v2185_v50  ;;  %2273 = vst [vmem:[#allocation16 + $0x2c] sm:$0xff] %v2265_v53 }
 0x310   :  { %v2215_v56 = vmul.f32 1.442695, %v2195_v52 }
 0x312   :  { %3576 = vpow2.f32 %v2215_v56 }
 0x313   :  { %v2186_v61 = vpop.f32.mrf.mxu3 }
 0x314   :  { %v2187_v62 = vadd.f32 %v2186_v61, %v2173_v59 }
 0x316   :  { %v2202_v0 = vsub.f32 0.0, %v2187_v62 }
 0x318   :  { %v3577_v1 = vpop.eup %3576  ;;  %v2229_v57 = vmul.f32 1.442695, %v2202_v0 }
 0x319   :  { %v2237_v2 = vadd.f32 1.0, %v3577_v1 }
 0x31a   :  { %3578 = vpow2.f32 %v2229_v57 }
 0x31b   :  { %3580 = vrcp.f32 %v2237_v2 }
 0x320   :  { %v3579_v3 = vpop.eup %3578 }
 0x321   :  { %v3581_v33 = vpop.eup %3580  ;;  %v2244_v5 = vadd.f32 1.0, %v3579_v3 }
 0x322   :  { %v2262_v6 = vpack.c.bf16 %v3581_v33, %v3581_v33 }
 0x323   :  { %3582 = vrcp.f32 %v2244_v5 }
 0x324   :  { %2270 = vst [vmem:[#allocation16 + $0x18] sm:$0xf] %v2262_v6 }
 0x329   :  { %v3583_v58 = vpop.eup %3582 }
 0x32a   :  { %v2266_v7 = vpack.c.bf16 %v3583_v58, %v3583_v58 }
 0x32c   :  { %2274 = vst [vmem:[#allocation16 + $0x34] sm:$0xf] %v2266_v7 }
 0x32d   :  { %2287 = dma.vmem_to_hbm [thread:$0]  %s2280_s28, 896, %s2282_s10, [#allocation4], %s3826_s27, %s3826_s27, %s3827_s3  }
 0x32e   :  { %3810 = dma.done.wait [#allocation4], 896  }
 0x32f   :  { %3811 = vsyncadd [#allocation4], 4294966400 }
 0x330   :  { %2292 = vsyncpa [#allocation3], 1 }
 0x331   :  { %2293 = vsyncpa [#allocation6], 1 }
 0x332   :  { %2294 = vsyncpa [#allocation9], 1 }
 0x333   :  { %2295 = vsyncpa [#allocation12], 1 }
 0x334   :  { %2296 = vsyncpa [#allocation15], 1 }
 0x335   :  { %2297 = vsyncpa [#allocation4], 1 }

</bundles_post_ra>
